<compile_context>
chip_gen: v7x
topology: tpu7x:2x2x1
jax: 0.10.0
libtpu: 0.0.40
codegen_flags: <defaults>
</compile_context>

<pallas_src>
import functools

import jax
import jax.numpy as jnp
from jax import lax
from jax.experimental import pallas as pl
from jax.experimental.pallas import tpu as pltpu


_CH_CHUNK = 256            # depthwise/projection channel strip (lanes)
_MIB = 1024 * 1024


# ---------------------------------------------------------------------------
# Helpers
# ---------------------------------------------------------------------------

def _round_up(v, m):
    return ((v + m - 1) // m) * m


def _vmem_capacity_bytes():
    try:
        cap = getattr(pltpu.get_tpu_info(), "vmem_capacity_bytes", None)
        if cap:
            return int(cap)
    except Exception:
        pass
    return 64 * _MIB       # conservative fallback (v7x per-TC size)


def _plan_tiling(*, N, Ho, W, Wo, stride, Hp, Wp, Wo_pad, inp, hidden, oup,
                 ct_bytes, io_bytes, has_expand, use_res, forced_th=None):
    """Pick the largest row tile TH (divisor of Ho) whose per-step working set
    fits a generation-aware VMEM budget; derive vmem_limit_bytes from usage."""
    vmem_cap = _vmem_capacity_bytes()
    # ~16 MiB strip budget on 128 MiB parts (v5e/v6e), ~8 MiB on 64 MiB (v7x).
    budget = min(max(vmem_cap // 8, 4 * _MIB), 32 * _MIB)

    w_bytes = (9 * hidden + hidden * oup) * ct_bytes + 4 * (hidden + oup)
    if has_expand:
        w_bytes += inp * hidden * ct_bytes + 4 * hidden
    xp_bytes = 2 * Hp * Wp * inp * ct_bytes            # double-buffered input block
    # TODO(synk): for very large spatial extents, stream x row tiles with a
    # manual halo DMA instead of keeping the full padded image block resident.

    def usage(th):
        ih = (th - 1) * stride + 3
        hid = ih * Wp * hidden * ct_bytes               # resident hidden strip (scratch)
        cw = min(hidden, _CH_CHUNK)
        live_dw = th * Wo_pad * (cw * (8 + ct_bytes) + 4 * oup)
        live_ex = ih * Wp * (inp * ct_bytes + 4 * hidden) if has_expand else 0
        out_blk = 2 * th * Wo * oup * io_bytes          # double-buffered output block
        res_blk = 2 * th * W * inp * io_bytes if use_res else 0
        return xp_bytes + w_bytes + hid + max(live_dw, live_ex) + out_blk + res_blk

    if forced_th is not None:
        th = forced_th
    else:
        fits = [d for d in range(1, Ho + 1) if Ho % d == 0 and usage(d) <= budget]
        if not fits:
            fits = [1]
        # Keep >= 2 grid steps overall so both v7x TensorCores get work.
        par = [d for d in fits if N * (Ho // d) >= 2]
        th = max(par) if par else max(fits)

    limit = int(min(vmem_cap * 3 // 4, max(usage(th) * 3 // 2 + 8 * _MIB, 32 * _MIB)))
    return th, limit


# ---------------------------------------------------------------------------
# Fused InvertedResidual kernel
# ---------------------------------------------------------------------------

def _fused_ir_kernel(*refs, has_expand, use_res, stride, W, Wo, Wo_pad,
                     TH, IH, bottom_pad, ch_chunk):
    i = 0
    xp_ref = refs[i]; i += 1
    if has_expand:
        w_exp_ref, b_exp_ref = refs[i], refs[i + 1]; i += 2
    w_dw_ref, b_dw_ref = refs[i], refs[i + 1]; i += 2
    w_pj_ref, b_pj_ref = refs[i], refs[i + 1]; i += 2
    xres_ref = None
    if use_res:
        xres_ref = refs[i]; i += 1
    o_ref, hid_ref = refs[i], refs[i + 1]

    ct = hid_ref.dtype
    Wp = hid_ref.shape[1]
    Ch = hid_ref.shape[2]
    oup = w_pj_ref.shape[1]

    rt = pl.program_id(1)
    r0p = rt * (TH * stride)                            # first padded input row of strip
    if (TH * stride) % 8 == 0:
        r0p = pl.multiple_of(r0p, 8)

    # ---- expand 1x1 (BN scale pre-folded into weights) + bias + ReLU6 -------
    xw = xp_ref[0, pl.ds(r0p, IH), :, :]                # (IH, Wp, Cin)
    if has_expand:
        x2 = xw.reshape(IH * Wp, xw.shape[-1])
        h2 = jnp.dot(x2, w_exp_ref[...], preferred_element_type=jnp.float32)
        h2 = jnp.clip(h2 + b_exp_ref[...], 0.0, 6.0)
        hid_ref[...] = h2.reshape(IH, Wp, Ch).astype(ct)
    else:
        hid_ref[...] = xw

    # ---- depthwise zero padding: only the border slices, not a full mask ----
    zc = jnp.zeros((IH, 1, Ch), ct)
    hid_ref[:, 0:1, :] = zc                             # left conv-pad column
    hid_ref[:, W + 1:W + 2, :] = zc                     # right conv-pad column

    @pl.when(rt == 0)                                   # top conv-pad row
    def _():
        hid_ref[0:1, :, :] = jnp.zeros((1, Wp, Ch), ct)

    if bottom_pad > 0:                                  # bottom conv-pad row(s)
        @pl.when(rt == pl.num_programs(1) - 1)
        def _():
            hid_ref[IH - bottom_pad:IH, :, :] = jnp.zeros((bottom_pad, Wp, Ch), ct)

    # ---- depthwise 3x3 + bias + ReLU6, then project 1x1 (channel-chunked) ---
    acc_out = jnp.zeros((TH * Wo_pad, oup), jnp.float32)
    for c0 in range(0, Ch, ch_chunk):
        cw = min(ch_chunk, Ch - c0)
        acc = jnp.zeros((TH, Wo_pad, cw), jnp.float32)
        for ki in range(3):
            for kj in range(3):
                if stride == 1:
                    win = hid_ref[ki:ki + TH, kj:kj + Wo_pad, c0:c0 + cw]
                else:
                    # TODO(synk): for stride=2, deinterleave even/odd planes once
                    # when writing hid_ref so these become contiguous reads.
                    win = hid_ref[pl.ds(ki, TH, stride=stride),
                                  pl.ds(kj, Wo_pad, stride=stride),
                                  c0:c0 + cw]
                tap = w_dw_ref[ki, kj:kj + 1, c0:c0 + cw]          # (1, cw)
                # multiply in compute dtype (bf16 VALU on v6e/v7x), accumulate f32
                acc = acc + (win * tap).astype(jnp.float32)
        y = jnp.clip(acc + b_dw_ref[:, c0:c0 + cw], 0.0, 6.0)
        acc_out = acc_out + jnp.dot(
            y.reshape(TH * Wo_pad, cw).astype(ct), w_pj_ref[c0:c0 + cw, :],
            preferred_element_type=jnp.float32)

    out = (acc_out + b_pj_ref[...]).reshape(TH, Wo_pad, oup)
    if Wo_pad != Wo:
        out = out[:, :Wo, :]
    if use_res:
        out = out + xres_ref[0].astype(jnp.float32)      # full-precision skip path
    # Lane-dense store: (Wo, oup) packed into one last dim -> unmasked vst.
    o_ref[0, 0] = out.reshape(TH, Wo * oup).astype(o_ref.dtype)


# ---------------------------------------------------------------------------
# InvertedResidual forward (wrapper, NCHW in / NCHW out)
# ---------------------------------------------------------------------------

def inverted_residual_forward(x_nchw, params, *, stride, expand_ratio,
                              compute_dtype=jnp.bfloat16, row_tile=None):
    assert stride in (1, 2)
    N, inp, H, W = x_nchw.shape
    oup = params["w_proj"].shape[1]
    hidden = params["w_dw"].shape[-1]
    has_expand = expand_ratio != 1
    use_res = (stride == 1) and (inp == oup)

    Ho = (H + 2 - 3) // stride + 1
    Wo = (W + 2 - 3) // stride + 1

    ct = jnp.dtype(compute_dtype)
    ct_bytes = ct.itemsize
    io_bytes = jnp.dtype(x_nchw.dtype).itemsize
    sub = max(8, 32 // ct_bytes)          # dtype-aware sublane tile: 8 f32 / 16 bf16
    Wo_pad = _round_up(Wo, sub)
    Wp = _round_up(max(W + 2, (Wo_pad - 1) * stride + 3), sub)
    Hp = H + 2

    TH, vmem_limit = _plan_tiling(
        N=N, Ho=Ho, W=W, Wo=Wo, stride=stride, Hp=Hp, Wp=Wp, Wo_pad=Wo_pad,
        inp=inp, hidden=hidden, oup=oup, ct_bytes=ct_bytes, io_bytes=io_bytes,
        has_expand=has_expand, use_res=use_res, forced_th=row_tile)
    assert Ho % TH == 0, f"row_tile {TH} must divide Ho={Ho}"
    nrt = Ho // TH
    IH = (TH - 1) * stride + 3
    bottom_pad = max(0, ((nrt - 1) * TH * stride + IH) - (H + 1))

    def fold(w, s):        # fold BN scale into the conv weight host-side (one time)
        return (w * s.reshape((1,) * (w.ndim - 1) + (-1,))).astype(compute_dtype)

    def bias(b):
        return b.reshape(1, -1).astype(jnp.float32)

    # TODO(synk): keep NHWC end-to-end across blocks; these layout passes are
    # wrapper-side HBM traffic kept only for NCHW interface parity with PyTorch.
    x_nhwc = jnp.transpose(x_nchw, (0, 2, 3, 1))
    xp = jnp.pad(x_nhwc.astype(compute_dtype),
                 ((0, 0), (1, 1), (1, Wp - W - 1), (0, 0)))

    args = [xp]
    in_specs = [pl.BlockSpec((1, Hp, Wp, inp), lambda n, r: (n, 0, 0, 0))]
    if has_expand:
        args += [fold(params["w_exp"], params["s_exp"]), bias(params["b_exp"])]
        in_specs += [pl.BlockSpec((inp, hidden), lambda n, r: (0, 0)),
                     pl.BlockSpec((1, hidden), lambda n, r: (0, 0))]
    args += [fold(params["w_dw"], params["s_dw"]), bias(params["b_dw"]),
             fold(params["w_proj"], params["s_proj"]), bias(params["b_proj"])]
    in_specs += [pl.BlockSpec((3, 3, hidden), lambda n, r: (0, 0, 0)),
                 pl.BlockSpec((1, hidden), lambda n, r: (0, 0)),
                 pl.BlockSpec((hidden, oup), lambda n, r: (0, 0)),
                 pl.BlockSpec((1, oup), lambda n, r: (0, 0))]
    if use_res:
        args += [x_nhwc]                  # skip path stays in the input dtype
        in_specs += [pl.BlockSpec((1, TH, W, inp), lambda n, r: (n, r, 0, 0))]

    kernel = functools.partial(
        _fused_ir_kernel, has_expand=has_expand, use_res=use_res, stride=stride,
        W=W, Wo=Wo, Wo_pad=Wo_pad, TH=TH, IH=IH, bottom_pad=bottom_pad,
        ch_chunk=_CH_CHUNK)

    out = pl.pallas_call(
        kernel,
        out_shape=jax.ShapeDtypeStruct((N, nrt, TH, Wo * oup), x_nchw.dtype),
        grid_spec=pltpu.PrefetchScalarGridSpec(
            num_scalar_prefetch=0,
            grid=(N, nrt),
            in_specs=in_specs,
            out_specs=pl.BlockSpec((1, 1, TH, Wo * oup), lambda n, r: (n, r, 0, 0)),
            scratch_shapes=[pltpu.VMEM((IH, Wp, hidden), compute_dtype)],
        ),
        compiler_params=pltpu.CompilerParams(
            dimension_semantics=("parallel", "parallel"),
            vmem_limit_bytes=vmem_limit),
    )(*args)

    out = out.reshape(N, Ho, Wo, oup)
    return jnp.transpose(out, (0, 3, 1, 2))            # NHWC -> NCHW


# ---------------------------------------------------------------------------
# Deterministic parameter construction (BN folded to scale/bias)
# ---------------------------------------------------------------------------

def make_params(key, inp, oup, expand_ratio):
    hidden = int(round(inp * expand_ratio))
    keys = jax.random.split(key, 8)

    def bn_fold(k, c):
        kg, kb, km, kv = jax.random.split(k, 4)
        gamma = jax.random.uniform(kg, (c,), jnp.float32, 0.5, 1.5)
        beta = jax.random.normal(kb, (c,), jnp.float32) * 0.1
        mean = jax.random.normal(km, (c,), jnp.float32) * 0.1
        var = jax.random.uniform(kv, (c,), jnp.float32, 0.5, 1.5)
        scale = gamma / jnp.sqrt(var + 1e-5)
        bias = beta - mean * scale
        return scale, bias

    params = {}
    if expand_ratio != 1:
        params["w_exp"] = jax.random.normal(keys[0], (inp, hidden), jnp.float32) * 0.1
        params["s_exp"], params["b_exp"] = bn_fold(keys[1], hidden)
    params["w_dw"] = jax.random.normal(keys[2], (3, 3, hidden), jnp.float32) * 0.1
    params["s_dw"], params["b_dw"] = bn_fold(keys[3], hidden)
    params["w_proj"] = jax.random.normal(keys[4], (hidden, oup), jnp.float32) * 0.1
    params["s_proj"], params["b_proj"] = bn_fold(keys[5], oup)
    return params


# ---------------------------------------------------------------------------
# Pure-JAX reference for verification
# ---------------------------------------------------------------------------

def reference(x_nchw, params, stride, expand_ratio):
    hp = lax.Precision.HIGHEST
    x = jnp.transpose(x_nchw, (0, 2, 3, 1))
    h = x
    if expand_ratio != 1:
        h = jnp.einsum('nhwc,cd->nhwd', h, params["w_exp"], precision=hp)
        h = jnp.clip(h * params["s_exp"] + params["b_exp"], 0.0, 6.0)
    C = h.shape[-1]
    h = lax.conv_general_dilated(
        h, params["w_dw"][:, :, None, :],
        window_strides=(stride, stride), padding=((1, 1), (1, 1)),
        dimension_numbers=('NHWC', 'HWIO', 'NHWC'), feature_group_count=C,
        precision=hp)
    h = jnp.clip(h * params["s_dw"] + params["b_dw"], 0.0, 6.0)
    h = jnp.einsum('nhwc,cd->nhwd', h, params["w_proj"], precision=hp)
    h = h * params["s_proj"] + params["b_proj"]
    if stride == 1 and x.shape[-1] == h.shape[-1]:
        h = h + x
    return jnp.transpose(h, (0, 3, 1, 2))


# ---------------------------------------------------------------------------

if __name__ == "__main__":
    key = jax.random.PRNGKey(0)
    kx, kp = jax.random.split(key)

    # N=2, inp=oup=16, 8x8 spatial, stride=1, expand_ratio=4 (hidden=64)
    N, inp, H, W = 2, 16, 8, 8
    oup, stride, expand_ratio = 16, 1, 4

    x = jax.random.normal(kx, (N, inp, H, W), jnp.float32)
    params = make_params(kp, inp, oup, expand_ratio)
    ref = reference(x, params, stride, expand_ratio)

    # f32 compute path (tight check vs reference).
    out_f32 = jax.block_until_ready(inverted_residual_forward(
        x, params, stride=stride, expand_ratio=expand_ratio,
        compute_dtype=jnp.float32))
    assert out_f32.shape == ref.shape == (N, oup, H, W)
    assert jnp.allclose(out_f32, ref, atol=5e-3, rtol=5e-3), "f32 mismatch vs reference"

    # bf16 compute path (halves HBM traffic / uses MXU bf16 peak; loose check).
    out_bf16 = jax.block_until_ready(inverted_residual_forward(
        x, params, stride=stride, expand_ratio=expand_ratio,
        compute_dtype=jnp.bfloat16))
    assert out_bf16.shape == ref.shape
    assert jnp.allclose(out_bf16, ref, atol=6e-2, rtol=6e-2), "bf16 mismatch vs reference"

    print("KERNEL_OK")
</pallas_src>

<mosaic_0001>
module attributes {stable_mosaic.version = 11 : i64} {
  func.func @_fused_ir_kernel(%arg0: i32, %arg1: i32, %arg2: memref<1x10x16x16xf32, #tpu.memory_space<vmem>>, %arg3: memref<16x64xf32, #tpu.memory_space<vmem>>, %arg4: memref<1x64xf32, #tpu.memory_space<vmem>>, %arg5: memref<3x3x64xf32, #tpu.memory_space<vmem>>, %arg6: memref<1x64xf32, #tpu.memory_space<vmem>>, %arg7: memref<64x16xf32, #tpu.memory_space<vmem>>, %arg8: memref<1x16xf32, #tpu.memory_space<vmem>>, %arg9: memref<1x8x8x16xf32, #tpu.memory_space<vmem>>, %arg10: memref<1x1x8x128xf32, #tpu.memory_space<vmem>>, %arg11: memref<10x16x64xf32, #tpu.memory_space<vmem>>) attributes {dimension_semantics = [#tpu.dimension_semantics<parallel>, #tpu.dimension_semantics<parallel>], iteration_bounds = array<i64: 2, 1>, scalar_prefetch = 0 : i64, scratch_operands = 1 : i64, tpu.core_type = #tpu.core_type<tc>, window_params = [{transform_indices = @transform_0, window_bounds = array<i64: 1, 10, 16, 16>}, {pipeline_mode = #tpu.pipeline_mode<synchronous>, transform_indices = @transform_1, window_bounds = array<i64: 16, 64>}, {pipeline_mode = #tpu.pipeline_mode<synchronous>, transform_indices = @transform_2, window_bounds = array<i64: 1, 64>}, {pipeline_mode = #tpu.pipeline_mode<synchronous>, transform_indices = @transform_3, window_bounds = array<i64: 3, 3, 64>}, {pipeline_mode = #tpu.pipeline_mode<synchronous>, transform_indices = @transform_4, window_bounds = array<i64: 1, 64>}, {pipeline_mode = #tpu.pipeline_mode<synchronous>, transform_indices = @transform_5, window_bounds = array<i64: 64, 16>}, {pipeline_mode = #tpu.pipeline_mode<synchronous>, transform_indices = @transform_6, window_bounds = array<i64: 1, 16>}, {transform_indices = @transform_7, window_bounds = array<i64: 1, 8, 8, 16>}, {transform_indices = @transform_8, window_bounds = array<i64: 1, 1, 8, 128>}]} {
    %c8_i32 = arith.constant 8 : i32
    %0 = arith.muli %arg1, %c8_i32 : i32
    %1 = tpu.assume_multiple %0, 8 : i32
    %c0 = arith.constant 0 : index
    %2 = arith.index_cast %1 : i32 to index
    %c0_0 = arith.constant 0 : index
    %c0_1 = arith.constant 0 : index
    %3 = vector.load %arg2[%c0, %2, %c0_0, %c0_1] : memref<1x10x16x16xf32, #tpu.memory_space<vmem>>, vector<1x10x16x16xf32>
    %4 = vector.shape_cast %3 : vector<1x10x16x16xf32> to vector<10x16x16xf32>
    %5 = vector.shape_cast %4 : vector<10x16x16xf32> to vector<160x16xf32>
    %c0_2 = arith.constant 0 : index
    %c0_3 = arith.constant 0 : index
    %6 = vector.load %arg3[%c0_2, %c0_3] : memref<16x64xf32, #tpu.memory_space<vmem>>, vector<16x64xf32>
    %cst = arith.constant dense<0.000000e+00> : vector<160x64xf32>
    %7 = tpu.matmul %5, %6, %cst {dimension_numbers = #tpu.dot_dimension_numbers<[1], [0], [0], [1], [0, 0, 1, 1], [], []>} : vector<160x16xf32>, vector<16x64xf32>, vector<160x64xf32> -> vector<160x64xf32>
    %c0_4 = arith.constant 0 : index
    %c0_5 = arith.constant 0 : index
    %8 = vector.load %arg4[%c0_4, %c0_5] : memref<1x64xf32, #tpu.memory_space<vmem>>, vector<1x64xf32>
    %9 = vector.broadcast %8 : vector<1x64xf32> to vector<160x64xf32>
    %10 = arith.addf %7, %9 : vector<160x64xf32>
    %cst_6 = arith.constant 0.000000e+00 : f32
    %cst_7 = arith.constant 6.000000e+00 : f32
    %11 = vector.broadcast %cst_6 : f32 to vector<160x64xf32>
    %12 = arith.maximumf %11, %10 : vector<160x64xf32>
    %13 = vector.broadcast %cst_7 : f32 to vector<160x64xf32>
    %14 = arith.minimumf %13, %12 : vector<160x64xf32>
    %15 = vector.shape_cast %14 : vector<160x64xf32> to vector<10x16x64xf32>
    %c0_8 = arith.constant 0 : index
    %c0_9 = arith.constant 0 : index
    %c0_10 = arith.constant 0 : index
    %16 = vector.load %arg11[%c0_8, %c0_9, %c0_10] : memref<10x16x64xf32, #tpu.memory_space<vmem>>, vector<10x16x64xf32>
    tpu.vector_store %arg11[%c0_8, %c0_9, %c0_10], %15 {strides = array<i32>} : memref<10x16x64xf32, #tpu.memory_space<vmem>>, vector<10x16x64xf32>,
    %cst_11 = arith.constant 0.000000e+00 : f32
    %17 = vector.broadcast %cst_11 : f32 to vector<10x1x64xf32>
    %c0_12 = arith.constant 0 : index
    %c0_13 = arith.constant 0 : index
    %c0_14 = arith.constant 0 : index
    %18 = vector.load %arg11[%c0_12, %c0_13, %c0_14] : memref<10x16x64xf32, #tpu.memory_space<vmem>>, vector<10x1x64xf32>
    tpu.vector_store %arg11[%c0_12, %c0_13, %c0_14], %17 {strides = array<i32>} : memref<10x16x64xf32, #tpu.memory_space<vmem>>, vector<10x1x64xf32>,
    %c0_15 = arith.constant 0 : index
    %c9 = arith.constant 9 : index
    %c0_16 = arith.constant 0 : index
    %19 = vector.load %arg11[%c0_15, %c9, %c0_16] : memref<10x16x64xf32, #tpu.memory_space<vmem>>, vector<10x1x64xf32>
    tpu.vector_store %arg11[%c0_15, %c9, %c0_16], %17 {strides = array<i32>} : memref<10x16x64xf32, #tpu.memory_space<vmem>>, vector<10x1x64xf32>,
    %c0_i32 = arith.constant 0 : i32
    %20 = arith.cmpi eq, %arg1, %c0_i32 : i32
    %21 = arith.extui %20 : i1 to i32
    %c0_i32_17 = arith.constant 0 : i32
    %22 = arith.cmpi ne, %21, %c0_i32_17 : i32
    scf.if %22 {
      %cst_91 = arith.constant 0.000000e+00 : f32
      %114 = vector.broadcast %cst_91 : f32 to vector<1x16x64xf32>
      %c0_92 = arith.constant 0 : index
      %c0_93 = arith.constant 0 : index
      %c0_94 = arith.constant 0 : index
      %115 = vector.load %arg11[%c0_92, %c0_93, %c0_94] : memref<10x16x64xf32, #tpu.memory_space<vmem>>, vector<1x16x64xf32>
      tpu.vector_store %arg11[%c0_92, %c0_93, %c0_94], %114 {strides = array<i32>} : memref<10x16x64xf32, #tpu.memory_space<vmem>>, vector<1x16x64xf32>,
    } else {
    }
    %c0_i32_18 = arith.constant 0 : i32
    %23 = arith.cmpi eq, %arg1, %c0_i32_18 : i32
    %24 = arith.extui %23 : i1 to i32
    %c0_i32_19 = arith.constant 0 : i32
    %25 = arith.cmpi ne, %24, %c0_i32_19 : i32
    scf.if %25 {
      %cst_91 = arith.constant 0.000000e+00 : f32
      %114 = vector.broadcast %cst_91 : f32 to vector<1x16x64xf32>
      %c9_92 = arith.constant 9 : index
      %c0_93 = arith.constant 0 : index
      %c0_94 = arith.constant 0 : index
      %115 = vector.load %arg11[%c9_92, %c0_93, %c0_94] : memref<10x16x64xf32, #tpu.memory_space<vmem>>, vector<1x16x64xf32>
      tpu.vector_store %arg11[%c9_92, %c0_93, %c0_94], %114 {strides = array<i32>} : memref<10x16x64xf32, #tpu.memory_space<vmem>>, vector<1x16x64xf32>,
    } else {
    }
    %cst_20 = arith.constant 0.000000e+00 : f32
    %26 = vector.broadcast %cst_20 : f32 to vector<64x16xf32>
    %cst_21 = arith.constant 0.000000e+00 : f32
    %27 = vector.broadcast %cst_21 : f32 to vector<8x8x64xf32>
    %c0_22 = arith.constant 0 : index
    %c0_23 = arith.constant 0 : index
    %c0_24 = arith.constant 0 : index
    %28 = vector.load %arg11[%c0_22, %c0_23, %c0_24] : memref<10x16x64xf32, #tpu.memory_space<vmem>>, vector<8x8x64xf32>
    %c0_25 = arith.constant 0 : index
    %c0_26 = arith.constant 0 : index
    %c0_27 = arith.constant 0 : index
    %29 = vector.load %arg5[%c0_25, %c0_26, %c0_27] : memref<3x3x64xf32, #tpu.memory_space<vmem>>, vector<1x1x64xf32>
    %30 = vector.shape_cast %29 : vector<1x1x64xf32> to vector<1x64xf32>
    %31 = vector.shape_cast %30 : vector<1x64xf32> to vector<1x1x64xf32>
    %32 = vector.broadcast %31 : vector<1x1x64xf32> to vector<8x8x64xf32>
    %33 = arith.mulf %28, %32 : vector<8x8x64xf32>
    %34 = arith.addf %27, %33 : vector<8x8x64xf32>
    %c0_28 = arith.constant 0 : index
    %c1 = arith.constant 1 : index
    %c0_29 = arith.constant 0 : index
    %35 = vector.load %arg11[%c0_28, %c1, %c0_29] : memref<10x16x64xf32, #tpu.memory_space<vmem>>, vector<8x8x64xf32>
    %c0_30 = arith.constant 0 : index
    %c1_31 = arith.constant 1 : index
    %c0_32 = arith.constant 0 : index
    %36 = vector.load %arg5[%c0_30, %c1_31, %c0_32] : memref<3x3x64xf32, #tpu.memory_space<vmem>>, vector<1x1x64xf32>
    %37 = vector.shape_cast %36 : vector<1x1x64xf32> to vector<1x64xf32>
    %38 = vector.shape_cast %37 : vector<1x64xf32> to vector<1x1x64xf32>
    %39 = vector.broadcast %38 : vector<1x1x64xf32> to vector<8x8x64xf32>
    %40 = arith.mulf %35, %39 : vector<8x8x64xf32>
    %41 = arith.addf %34, %40 : vector<8x8x64xf32>
    %c0_33 = arith.constant 0 : index
    %c2 = arith.constant 2 : index
    %c0_34 = arith.constant 0 : index
    %42 = vector.load %arg11[%c0_33, %c2, %c0_34] : memref<10x16x64xf32, #tpu.memory_space<vmem>>, vector<8x8x64xf32>
    %c0_35 = arith.constant 0 : index
    %c2_36 = arith.constant 2 : index
    %c0_37 = arith.constant 0 : index
    %43 = vector.load %arg5[%c0_35, %c2_36, %c0_37] : memref<3x3x64xf32, #tpu.memory_space<vmem>>, vector<1x1x64xf32>
    %44 = vector.shape_cast %43 : vector<1x1x64xf32> to vector<1x64xf32>
    %45 = vector.shape_cast %44 : vector<1x64xf32> to vector<1x1x64xf32>
    %46 = vector.broadcast %45 : vector<1x1x64xf32> to vector<8x8x64xf32>
    %47 = arith.mulf %42, %46 : vector<8x8x64xf32>
    %48 = arith.addf %41, %47 : vector<8x8x64xf32>
    %c1_38 = arith.constant 1 : index
    %c0_39 = arith.constant 0 : index
    %c0_40 = arith.constant 0 : index
    %49 = vector.load %arg11[%c1_38, %c0_39, %c0_40] : memref<10x16x64xf32, #tpu.memory_space<vmem>>, vector<8x8x64xf32>
    %c1_41 = arith.constant 1 : index
    %c0_42 = arith.constant 0 : index
    %c0_43 = arith.constant 0 : index
    %50 = vector.load %arg5[%c1_41, %c0_42, %c0_43] : memref<3x3x64xf32, #tpu.memory_space<vmem>>, vector<1x1x64xf32>
    %51 = vector.shape_cast %50 : vector<1x1x64xf32> to vector<1x64xf32>
    %52 = vector.shape_cast %51 : vector<1x64xf32> to vector<1x1x64xf32>
    %53 = vector.broadcast %52 : vector<1x1x64xf32> to vector<8x8x64xf32>
    %54 = arith.mulf %49, %53 : vector<8x8x64xf32>
    %55 = arith.addf %48, %54 : vector<8x8x64xf32>
    %c1_44 = arith.constant 1 : index
    %c1_45 = arith.constant 1 : index
    %c0_46 = arith.constant 0 : index
    %56 = vector.load %arg11[%c1_44, %c1_45, %c0_46] : memref<10x16x64xf32, #tpu.memory_space<vmem>>, vector<8x8x64xf32>
    %c1_47 = arith.constant 1 : index
    %c1_48 = arith.constant 1 : index
    %c0_49 = arith.constant 0 : index
    %57 = vector.load %arg5[%c1_47, %c1_48, %c0_49] : memref<3x3x64xf32, #tpu.memory_space<vmem>>, vector<1x1x64xf32>
    %58 = vector.shape_cast %57 : vector<1x1x64xf32> to vector<1x64xf32>
    %59 = vector.shape_cast %58 : vector<1x64xf32> to vector<1x1x64xf32>
    %60 = vector.broadcast %59 : vector<1x1x64xf32> to vector<8x8x64xf32>
    %61 = arith.mulf %56, %60 : vector<8x8x64xf32>
    %62 = arith.addf %55, %61 : vector<8x8x64xf32>
    %c1_50 = arith.constant 1 : index
    %c2_51 = arith.constant 2 : index
    %c0_52 = arith.constant 0 : index
    %63 = vector.load %arg11[%c1_50, %c2_51, %c0_52] : memref<10x16x64xf32, #tpu.memory_space<vmem>>, vector<8x8x64xf32>
    %c1_53 = arith.constant 1 : index
    %c2_54 = arith.constant 2 : index
    %c0_55 = arith.constant 0 : index
    %64 = vector.load %arg5[%c1_53, %c2_54, %c0_55] : memref<3x3x64xf32, #tpu.memory_space<vmem>>, vector<1x1x64xf32>
    %65 = vector.shape_cast %64 : vector<1x1x64xf32> to vector<1x64xf32>
    %66 = vector.shape_cast %65 : vector<1x64xf32> to vector<1x1x64xf32>
    %67 = vector.broadcast %66 : vector<1x1x64xf32> to vector<8x8x64xf32>
    %68 = arith.mulf %63, %67 : vector<8x8x64xf32>
    %69 = arith.addf %62, %68 : vector<8x8x64xf32>
    %c2_56 = arith.constant 2 : index
    %c0_57 = arith.constant 0 : index
    %c0_58 = arith.constant 0 : index
    %70 = vector.load %arg11[%c2_56, %c0_57, %c0_58] : memref<10x16x64xf32, #tpu.memory_space<vmem>>, vector<8x8x64xf32>
    %c2_59 = arith.constant 2 : index
    %c0_60 = arith.constant 0 : index
    %c0_61 = arith.constant 0 : index
    %71 = vector.load %arg5[%c2_59, %c0_60, %c0_61] : memref<3x3x64xf32, #tpu.memory_space<vmem>>, vector<1x1x64xf32>
    %72 = vector.shape_cast %71 : vector<1x1x64xf32> to vector<1x64xf32>
    %73 = vector.shape_cast %72 : vector<1x64xf32> to vector<1x1x64xf32>
    %74 = vector.broadcast %73 : vector<1x1x64xf32> to vector<8x8x64xf32>
    %75 = arith.mulf %70, %74 : vector<8x8x64xf32>
    %76 = arith.addf %69, %75 : vector<8x8x64xf32>
    %c2_62 = arith.constant 2 : index
    %c1_63 = arith.constant 1 : index
    %c0_64 = arith.constant 0 : index
    %77 = vector.load %arg11[%c2_62, %c1_63, %c0_64] : memref<10x16x64xf32, #tpu.memory_space<vmem>>, vector<8x8x64xf32>
    %c2_65 = arith.constant 2 : index
    %c1_66 = arith.constant 1 : index
    %c0_67 = arith.constant 0 : index
    %78 = vector.load %arg5[%c2_65, %c1_66, %c0_67] : memref<3x3x64xf32, #tpu.memory_space<vmem>>, vector<1x1x64xf32>
    %79 = vector.shape_cast %78 : vector<1x1x64xf32> to vector<1x64xf32>
    %80 = vector.shape_cast %79 : vector<1x64xf32> to vector<1x1x64xf32>
    %81 = vector.broadcast %80 : vector<1x1x64xf32> to vector<8x8x64xf32>
    %82 = arith.mulf %77, %81 : vector<8x8x64xf32>
    %83 = arith.addf %76, %82 : vector<8x8x64xf32>
    %c2_68 = arith.constant 2 : index
    %c2_69 = arith.constant 2 : index
    %c0_70 = arith.constant 0 : index
    %84 = vector.load %arg11[%c2_68, %c2_69, %c0_70] : memref<10x16x64xf32, #tpu.memory_space<vmem>>, vector<8x8x64xf32>
    %c2_71 = arith.constant 2 : index
    %c2_72 = arith.constant 2 : index
    %c0_73 = arith.constant 0 : index
    %85 = vector.load %arg5[%c2_71, %c2_72, %c0_73] : memref<3x3x64xf32, #tpu.memory_space<vmem>>, vector<1x1x64xf32>
    %86 = vector.shape_cast %85 : vector<1x1x64xf32> to vector<1x64xf32>
    %87 = vector.shape_cast %86 : vector<1x64xf32> to vector<1x1x64xf32>
    %88 = vector.broadcast %87 : vector<1x1x64xf32> to vector<8x8x64xf32>
    %89 = arith.mulf %84, %88 : vector<8x8x64xf32>
    %90 = arith.addf %83, %89 : vector<8x8x64xf32>
    %c0_74 = arith.constant 0 : index
    %c0_75 = arith.constant 0 : index
    %91 = vector.load %arg6[%c0_74, %c0_75] : memref<1x64xf32, #tpu.memory_space<vmem>>, vector<1x64xf32>
    %92 = vector.shape_cast %91 : vector<1x64xf32> to vector<1x1x64xf32>
    %93 = vector.broadcast %92 : vector<1x1x64xf32> to vector<8x8x64xf32>
    %94 = arith.addf %90, %93 : vector<8x8x64xf32>
    %cst_76 = arith.constant 0.000000e+00 : f32
    %cst_77 = arith.constant 6.000000e+00 : f32
    %95 = vector.broadcast %cst_76 : f32 to vector<8x8x64xf32>
    %96 = arith.maximumf %95, %94 : vector<8x8x64xf32>
    %97 = vector.broadcast %cst_77 : f32 to vector<8x8x64xf32>
    %98 = arith.minimumf %97, %96 : vector<8x8x64xf32>
    %99 = vector.shape_cast %98 : vector<8x8x64xf32> to vector<64x64xf32>
    %c0_78 = arith.constant 0 : index
    %c0_79 = arith.constant 0 : index
    %100 = vector.load %arg7[%c0_78, %c0_79] : memref<64x16xf32, #tpu.memory_space<vmem>>, vector<64x16xf32>
    %cst_80 = arith.constant dense<0.000000e+00> : vector<64x16xf32>
    %101 = tpu.matmul %99, %100, %cst_80 {dimension_numbers = #tpu.dot_dimension_numbers<[1], [0], [0], [1], [0, 0, 1, 1], [], []>} : vector<64x64xf32>, vector<64x16xf32>, vector<64x16xf32> -> vector<64x16xf32>
    %102 = arith.addf %26, %101 : vector<64x16xf32>
    %c0_81 = arith.constant 0 : index
    %c0_82 = arith.constant 0 : index
    %103 = vector.load %arg8[%c0_81, %c0_82] : memref<1x16xf32, #tpu.memory_space<vmem>>, vector<1x16xf32>
    %104 = vector.broadcast %103 : vector<1x16xf32> to vector<64x16xf32>
    %105 = arith.addf %102, %104 : vector<64x16xf32>
    %106 = vector.shape_cast %105 : vector<64x16xf32> to vector<8x8x16xf32>
    %c0_83 = arith.constant 0 : index
    %c0_84 = arith.constant 0 : index
    %c0_85 = arith.constant 0 : index
    %c0_86 = arith.constant 0 : index
    %107 = vector.load %arg9[%c0_83, %c0_84, %c0_85, %c0_86] : memref<1x8x8x16xf32, #tpu.memory_space<vmem>>, vector<1x8x8x16xf32>
    %108 = vector.shape_cast %107 : vector<1x8x8x16xf32> to vector<8x8x16xf32>
    %109 = arith.addf %106, %108 : vector<8x8x16xf32>
    %110 = vector.shape_cast %109 : vector<8x8x16xf32> to vector<8x128xf32>
    %c0_87 = arith.constant 0 : index
    %c0_88 = arith.constant 0 : index
    %c0_89 = arith.constant 0 : index
    %c0_90 = arith.constant 0 : index
    %111 = vector.load %arg10[%c0_87, %c0_88, %c0_89, %c0_90] : memref<1x1x8x128xf32, #tpu.memory_space<vmem>>, vector<1x1x8x128xf32>
    %112 = vector.shape_cast %111 : vector<1x1x8x128xf32> to vector<8x128xf32>
    %113 = vector.shape_cast %110 : vector<8x128xf32> to vector<1x1x8x128xf32>
    tpu.vector_store %arg10[%c0_87, %c0_88, %c0_89, %c0_90], %113 {strides = array<i32>} : memref<1x1x8x128xf32, #tpu.memory_space<vmem>>, vector<1x1x8x128xf32>,
    return
  }
  func.func @transform_0(%arg0: i32, %arg1: i32) -> (i32, i32, i32, i32) {
    %c0_i32 = arith.constant 0 : i32
    %c0_i32_0 = arith.constant 0 : i32
    %c0_i32_1 = arith.constant 0 : i32
    %c0_i32_2 = arith.constant 0 : i32
    return %arg0, %c0_i32, %c0_i32_0, %c0_i32_1 : i32, i32, i32, i32
  }
  func.func @transform_1(%arg0: i32, %arg1: i32) -> (i32, i32) {
    %c0_i32 = arith.constant 0 : i32
    %c0_i32_0 = arith.constant 0 : i32
    %c0_i32_1 = arith.constant 0 : i32
    return %c0_i32, %c0_i32_0 : i32, i32
  }
  func.func @transform_2(%arg0: i32, %arg1: i32) -> (i32, i32) {
    %c0_i32 = arith.constant 0 : i32
    %c0_i32_0 = arith.constant 0 : i32
    %c0_i32_1 = arith.constant 0 : i32
    return %c0_i32, %c0_i32_0 : i32, i32
  }
  func.func @transform_3(%arg0: i32, %arg1: i32) -> (i32, i32, i32) {
    %c0_i32 = arith.constant 0 : i32
    %c0_i32_0 = arith.constant 0 : i32
    %c0_i32_1 = arith.constant 0 : i32
    %c0_i32_2 = arith.constant 0 : i32
    return %c0_i32, %c0_i32_0, %c0_i32_1 : i32, i32, i32
  }
  func.func @transform_4(%arg0: i32, %arg1: i32) -> (i32, i32) {
    %c0_i32 = arith.constant 0 : i32
    %c0_i32_0 = arith.constant 0 : i32
    %c0_i32_1 = arith.constant 0 : i32
    return %c0_i32, %c0_i32_0 : i32, i32
  }
  func.func @transform_5(%arg0: i32, %arg1: i32) -> (i32, i32) {
    %c0_i32 = arith.constant 0 : i32
    %c0_i32_0 = arith.constant 0 : i32
    %c0_i32_1 = arith.constant 0 : i32
    return %c0_i32, %c0_i32_0 : i32, i32
  }
  func.func @transform_6(%arg0: i32, %arg1: i32) -> (i32, i32) {
    %c0_i32 = arith.constant 0 : i32
    %c0_i32_0 = arith.constant 0 : i32
    %c0_i32_1 = arith.constant 0 : i32
    return %c0_i32, %c0_i32_0 : i32, i32
  }
  func.func @transform_7(%arg0: i32, %arg1: i32) -> (i32, i32, i32, i32) {
    %c0_i32 = arith.constant 0 : i32
    %c0_i32_0 = arith.constant 0 : i32
    %c0_i32_1 = arith.constant 0 : i32
    return %arg0, %arg1, %c0_i32, %c0_i32_0 : i32, i32, i32, i32
  }
  func.func @transform_8(%arg0: i32, %arg1: i32) -> (i32, i32, i32, i32) {
    %c0_i32 = arith.constant 0 : i32
    %c0_i32_0 = arith.constant 0 : i32
    %c0_i32_1 = arith.constant 0 : i32
    return %arg0, %arg1, %c0_i32, %c0_i32_0 : i32, i32, i32, i32
  }
}

</mosaic_0001>

<bundles_post_ra>
// kernel: tpu_custom_call.1
= control target key start
LH: loop header
LB: loop body
LE: loop exit
PB: predicated region body
PF: predicated region fallthrough
CT: control target
= control target key end

     0   :  { %s2512_s0 = inlined_call_operand.hbm [shape: f32[2,10,16,16], index: 0, kind: input, shape index: {}]   ;;  %s2513_s1 = inlined_call_operand.vmem [shape: f32[16,64], index: 1, kind: input, shape index: {}]   ;;  %s2514_s2 = inlined_call_operand.vmem [shape: f32[1,64], index: 2, kind: input, shape index: {}]   ;;  %s2515_s3 = inlined_call_operand.vmem [shape: f32[3,3,64], index: 3, kind: input, shape index: {}]   ;;  %s2516_s4 = inlined_call_operand.vmem [shape: f32[1,64], index: 4, kind: input, shape index: {}]   ;;  %s2517_s5 = inlined_call_operand.vmem [shape: f32[64,16], index: 5, kind: input, shape index: {}]   ;;  %s2518_s6 = inlined_call_operand.vmem [shape: f32[1,16], index: 6, kind: input, shape index: {}]   ;;  %s2519_s7 = inlined_call_operand.hbm [shape: f32[2,8,8,16], index: 7, kind: input, shape index: {}]   ;;  %s2520_s8 = inlined_call_operand.hbm [shape: f32[2,1,8,128], index: 8, kind: output, shape index: {}]  }
   0x1   :  { %2526 = sst [smem:[#allocation15_spill]] %s2512_s0 }
   0x2   :  { %13 = vsyncpa [#allocation4], 0 }
   0x3   :  { %15 = vsyncpa [#allocation4 + $0x1], 0 }
   0x4   :  { %16 = vsyncpa [#allocation7], 0 }
   0x5   :  { %18 = vsyncpa [#allocation7 + $0x1], 0 }
   0x6   :  { %19 = vsyncpa [#allocation5], 0 }
   0x7   :  { %21 = vsyncpa [#allocation5 + $0x1], 0  ;;  %s1959_s27 = smov 0   ;;  %s1961_s28 = smov 0  }
   0x8   :  { %s1963_s29 = smov 0   ;;  %s1965_s30 = smov 0  }
   0x9   :  { %s1967_s9 = smov 0   ;;  %s1969_s10 = smov 0  }
   0xa LB: > { %2527 = sst [smem:[#allocation12_spill]] %s1885_s29  ;;  %s1487_s11 = sadd.s32 4294967295, %s1897_s10   ;;  %s1897_s10 = sphi %s1969_s10, %s27_s10   ;;  %s1893_s9 = sphi %s1967_s9, %s2549_s9   ;;  %s1889_s30 = sphi %s1965_s30, %s2548_s30   ;;  %s1885_s29 = sphi %s1963_s29, %s2544_s29   ;;  %s1881_s28 = sphi %s1961_s28, %s2547_s28   ;;  %s1877_s27 = sphi %s1959_s27, %s2546_s27  }
   0xb   : > { %s1488_s12 = sadd.s32 4294967294, %s1897_s10   ;;  %s39_s13 = sadd.s32 1, %s1893_s9 }
   0xc   : > { %s46_s14 = sadd.s32 1, %s1885_s29  ;;  %p41_p0 = scmp.ge.s32.totalorder %s39_s13, 2 }
   0xd   : > { %p53_p1 = scmp.ne.s32.totalorder %s1885_s29, %s1881_s28  ;;  %p54_p2 = scmp.eq.s32.totalorder %s1897_s10, 0 }
   0xe   : > { %p59_p3 = scmp.ne.s32.totalorder %s1881_s28, %s1877_s27  ;;  %s2551_s13 = smov (%p41_p0, %s39_s13), 0 }
   0xf   : > { %2528 = sst [smem:[#allocation13_spill]] %s2551_s13  ;;  %p2000_p4 = por %p54_p2, %p53_p1 }
  0x10   : > { %p60_p5 = scmp.eq.s32.totalorder %s1487_s11, 0  ;;  %s43_s16 = ssub.s32 %s1893_s9, %s2551_s13 }
  0x11   : > { %p239_p6 = scmp.eq.s32.totalorder %s1487_s11, 1  ;;  %p44_p7 = scmp.eq.s32.totalorder %s43_s16, 0 }
  0x12   : > { %p2006_p8 = por %p60_p5, %p59_p3  ;;  %p245_p10 = scmp.eq.s32.totalorder %s1488_s12, 1 }
  0x13   : > { %p2010_p9 = por %p239_p6, %p53_p1  ;;  %p1689_p13 = scmp.lt.s32.totalorder %s1897_s10, 2 }
  0x14   : > { %s2530_s17 = scalar_select %p2006_p8, 1, 0 }
  0x15   : > { %s2531_s18 = scalar_select %p2010_p9, 1, 0 }
  0x16   : > { %s2015_s19 = scalar_select %p44_p7, %s1885_s29, %s46_s14  }
  0x17   : > { %p2017_p11 = por %p245_p10, %p59_p3  ;;  %s2024_s21 = sand.u32 1, %s1885_s29  }
  0x18   : > { %2532 = sst [smem:[#allocation14_spill]] %s2015_s19  ;;  %s1669_s22 = smul.u32 160, %s2024_s21 }
  0x19   : > { %s2533_s20 = scalar_select %p2017_p11, 1, 0 }
  0x1a   : > { %s1670_s23 = smul.u32 2560, %s1893_s9  ;;  %p2030_p0 = pnand %p1689_p13, %p2000_p4 }
  0x1b   : > { %s2535_s0 = sld [smem:[#allocation15_spill]]  ;;  %s287_s12 = scalar_lea.vmem [#allocation3], %s1669_s22 }
  0x1c   : > { %s294_s14 = sshll.u32 %s287_s12, 4  ;;  %s284_s15 = scalar_lea.sflag [#allocation4], %s2024_s21  ;;  %s2039_s14 = int_to_ptr.vmem [resolvable:$true] %s294_s14 }
  0x1d   : > { %p1753_p3 = pneg %p2030_p0 }
  0x21   : > { %s2037_s11 = scalar_lea.hbm %s2535_s0, %s1670_s23  ;;  %s1756_s26 = scalar_lea.hbm %s2535_s0, 5120 }
  0x22   : > { %s1751_s16 = scalar_lea.hbm %s2037_s11, 2560  ;;  %p1757_p6 = scmp.lt.u32.totalorder %s2037_s11, %s2535_s0 }
  0x23   : > { %p1752_p2 = scmp.ne.s32.totalorder %s2037_s11, %s1751_s16  ;;  %p1758_p7 = scmp.lt.u32.totalorder %s1756_s26, %s1751_s16 }
  0x24   : > { %p1760_p13 = scmp.lt.u32.totalorder %s1751_s16, %s2037_s11 }
  0x25   : > { %p1754_p4 = pnand %p1753_p3, %p1752_p2  ;;  %p1759_p10 = por %p1758_p7, %p1757_p6 }
  0x27   : > { %p1755_p5 = pneg %p1754_p4  ;;  %p1761_p12 = por %p1760_p13, %p1759_p10 }
  0x29   : > { %p1762_p1 = pnand %p1761_p12, %p1755_p5 }
  0x2b   : > { %1765 = shalt.err (!%p1762_p1)
}
  0x2c   : > { %s1766_s22 = scalar_lea.vmem %s2039_s14, 2560  ;;  %s1899_s12 = smov [#allocation3]  }
  0x2d   : > { %p1767_p2 = scmp.ne.s32.totalorder %s2039_s14, %s1766_s22  ;;  %s1771_s23 = sshll.u32 %s1899_s12, 4  ;;  %s1772_s23 = int_to_ptr.vmem [resolvable:$false] %s1771_s23 }
  0x2e   : > { %s1773_s13 = scalar_lea.vmem %s1772_s23, 5120  ;;  %p1774_p9 = scmp.lt.s32.totalorder %s2039_s14, %s1772_s23 }
  0x2f   : > { %p1769_p4 = pnand %p1767_p2, %p1753_p3  ;;  %p1775_p6 = scmp.lt.s32.totalorder %s1773_s13, %s1766_s22 }
  0x31   : > { %p1770_p11 = pneg %p1769_p4  ;;  %p1776_p7 = por %p1775_p6, %p1774_p9 }
  0x33   : > { %p1777_p10 = pnand %p1776_p7, %p1770_p11 }
  0x35   : > { %1780 = shalt.err (!%p1777_p10)
}
  0x36   : > { %s2524_s19 = smov 128   ;;  %s1901_s16 = smov 8  }
  0x37   : > { %1681 = dma.hbm_to_vmem [thread:$0]  (!%p2030_p0), %s2037_s11, 2560, %s2039_s14, %s284_s15, %s2524_s19, %s2524_s19, %s1901_s16  }
  0x38   : > { %p325_p9 = scmp.lt.s32.totalorder %s1897_s10, 3  ;;  %s1492_s25 = sshll.u32 %s2024_s21, 6 }
  0x39   : > { %s1548_s26 = sshll.u32 %s1893_s9, 10  ;;  %p2536_p11 = scmp.ge.s32.totalorder %s1897_s10, 1 }
  0x3a   : > { %s2085_s13 = scalar_lea.hbm %s2519_s7, %s1548_s26  ;;  %s308_s0 = scalar_lea.vmem [#allocation6], %s1492_s25 }
  0x3b   : > { %p2078_p12 = pnand %p2536_p11, %p325_p9  ;;  %s317_s29 = sshll.u32 %s308_s0, 4  ;;  %s2087_s29 = int_to_ptr.vmem [resolvable:$true] %s317_s29 }
  0x3c   : > { %s305_s11 = scalar_lea.sflag [#allocation7], %s2024_s21  ;;  %s1781_s14 = scalar_lea.hbm %s2085_s13, 1024 }
  0x3d   : > { %p1782_p1 = scmp.ne.s32.totalorder %s2085_s13, %s1781_s14  ;;  %s1786_s26 = scalar_lea.hbm %s2519_s7, 2048 }
  0x3e   : > { %p1787_p2 = scmp.lt.u32.totalorder %s2085_s13, %s2519_s7  ;;  %p1788_p4 = scmp.lt.u32.totalorder %s1786_s26, %s1781_s14 }
  0x3f   : > { %p1784_p5 = pnand %p1782_p1, %p1753_p3  ;;  %p1790_p7 = scmp.lt.u32.totalorder %s1781_s14, %s2085_s13 }
  0x40   : > { %p1789_p6 = por %p1788_p4, %p1787_p2 }
  0x41   : > { %p1785_p13 = pneg %p1784_p5 }
  0x42   : > { %p1791_p10 = por %p1790_p7, %p1789_p6 }
  0x44   : > { %p1792_p9 = pnand %p1791_p10, %p1785_p13 }
  0x46   : > { %1795 = shalt.err (!%p1792_p9)
}
  0x47   : > { %s1796_s0 = scalar_lea.vmem %s2087_s29, 1024  ;;  %s1902_s19 = smov [#allocation6]  }
  0x48   : > { %p1797_p11 = scmp.ne.s32.totalorder %s2087_s29, %s1796_s0  ;;  %s1801_s25 = sshll.u32 %s1902_s19, 4  ;;  %s1802_s25 = int_to_ptr.vmem [resolvable:$false] %s1801_s25 }
  0x49   : > { %s1803_s15 = scalar_lea.vmem %s1802_s25, 2048  ;;  %p1804_p8 = scmp.lt.s32.totalorder %s2087_s29, %s1802_s25 }
  0x4a   : > { %p1799_p1 = pnand %p1797_p11, %p1753_p3  ;;  %p1805_p2 = scmp.lt.s32.totalorder %s1803_s15, %s1796_s0 }
  0x4c   : > { %p1800_p5 = pneg %p1799_p1  ;;  %p1806_p4 = por %p1805_p2, %p1804_p8 }
  0x4e   : > { %p1807_p6 = pnand %p1806_p4, %p1800_p5 }
  0x50   : > { %1810 = shalt.err (!%p1807_p6)
}
  0x51   : > { %s2538_s14 = smov 128   ;;  %329 = sbr.rel (%p2078_p12) target bundleno = 760 (0x2f8), region = 52 }
  0x52   : > { %1684 = dma.hbm_to_vmem [thread:$0]  (!%p2030_p0), %s2085_s13, 1024, %s2087_s29, %s305_s11, %s2538_s14, %s2538_s14, %s1901_s16  }
  0x53   : > { %s2121_s26 = sand.u32 (!%p2078_p12), 1, %s1881_s28   ;;  %p2539_p8 = scmp.ne.s32.totalorder (!%p2078_p12), %s2530_s17, 0 }
  0x54   : > { %s1671_s12 = smul.u32 (!%p2078_p12), 160, %s2121_s26  ;;  %s332_s23 = scalar_lea.sflag (!%p2078_p12), [#allocation4], %s2121_s26 }
  0x56   : > { %s2125_s24 = scalar_lea.vmem (!%p2078_p12), [#allocation3], %s1671_s12 }
  0x58   : > { %1864 = dma.done.wait (%p2539_p8), %s332_s23, 2560  }
  0x59   : > { %1866 = vsyncadd (%p2539_p8), %s332_s23, 4294964736  ;;  %s1496_s29 = sshll.u32 %s2121_s26, 6  ;;  %s341_s21 = scalar_lea.sflag [#allocation7], %s2121_s26 }
  0x5a   : > { %s2133_s16 = scalar_lea.vmem [#allocation6], %s1496_s29 }
  0x5b   : > { %1868 = dma.done.wait (%p2539_p8), %s341_s21, 1024  }
  0x5c   : > { %1870 = vsyncadd (%p2539_p8), %s341_s21, 4294966272  ;;  %vm415_vm0 = vcmask 130048   ;;  %v406_v0 = vld [vmem:[%s2513_s1] sm:$0xff]  ;;  %v407_v1 = vld [vmem:[%s2513_s1 + $0x8] sm:$0xff]  ;;  %vm681_vm1 = vcmask 523264   ;;  %vm702_vm2 = vcmask 516096  }
  0x5d   : > { %v386_v2 = vld [vmem:[%s2125_s24] sm:$0xff]  ;;  %v1649_v3 = vpack.c.bf16 %v407_v1, %v406_v0  ;;  %v387_v4 = vld [vmem:[%s2125_s24 + $0x8] sm:$0xff]  ;;  %v388_v5 = vld [vmem:[%s2125_s24 + $0x10] sm:$0xff]  ;;  %v1903_v49 = vmov 0.0   ;;  %s1907_s11 = smov 16   ;;  %s1908_s0 = smov 64  }
  0x5e   : > { %1591 = vmatprep.mubr.msk.f32.mxu0 %vm415_vm0, %v386_v2  ;;  %v389_v6 = vld [vmem:[%s2125_s24 + $0x18] sm:$0xff]  ;;  %v390_v7 = vld [vmem:[%s2125_s24 + $0x20] sm:$0xff]  ;;  %v391_v8 = vld [vmem:[%s2125_s24 + $0x28] sm:$0xff]  ;;  %s1909_s17 = smov 32   ;;  %s1910_s19 = smov 96   ;;  %vm1353_vm3 = vcmask 261120  }
  0x5f   : > { %1650 = vmatprep.subr.bf16.mxu0 %v1649_v3  ;;  %v392_v9 = vld [vmem:[%s2125_s24 + $0x30] sm:$0xff]  ;;  %v393_v10 = vld [vmem:[%s2125_s24 + $0x38] sm:$0xff]  ;;  %v394_v11 = vld [vmem:[%s2125_s24 + $0x40] sm:$0xff]  ;;  %s1911_s25 = smov 80   ;;  %s1912_s15 = smov 112   ;;  %vm1355_vm4 = vcmask 392192  }
  0x60   : > { %1652 = vmatpush3.bf16.msra.mxu0 %v1649_v3  ;;  %v395_v12 = vld [vmem:[%s2125_s24 + $0x48] sm:$0xff]  ;;  %v396_v13 = vld [vmem:[%s2125_s24 + $0x50] sm:$0xff]  ;;  %v397_v14 = vld [vmem:[%s2125_s24 + $0x58] sm:$0xff]  ;;  %s1497_s14 = sshll.u32 %s2121_s26, 3  ;;  %vm1358_vm5 = vcmask 654336   ;;  %vm1360_vm6 = vcmask 785408  }
  0x61   : > { %v398_v15 = vld [vmem:[%s2125_s24 + $0x60] sm:$0xff]  ;;  %v399_v16 = vld [vmem:[%s2125_s24 + $0x68] sm:$0xff]  ;;  %v400_v17 = vld [vmem:[%s2125_s24 + $0x70] sm:$0xff]  ;;  %s1545_s12 = sshll.u32 %s1889_s30, 7  ;;  %s381_s23 = scalar_lea.vmem [#allocation8], %s1497_s14  ;;  %vm1362_vm7 = vcmask 916480  }
  0x62   : > { %v401_v18 = vld [vmem:[%s2125_s24 + $0x78] sm:$0xff]  ;;  %v402_v19 = vld [vmem:[%s2125_s24 + $0x80] sm:$0xff]  ;;  %v403_v20 = vld [vmem:[%s2125_s24 + $0x88] sm:$0xff]  ;;  %s1380_s29 = sshll.u32 %s381_s23, 4  ;;  %s2463_s22 = scalar_lea.hbm %s2520_s8, %s1545_s12  ;;  %s2465_s29 = int_to_ptr.vmem [resolvable:$true] %s1380_s29 }
  0x63   : > { %1592 = vmatmul.mubr.msk.f32.vlgmr.msra.gmra.mrb[0].mxu0 %vm415_vm0, %v387_v4  ;;  %v404_v21 = vld [vmem:[%s2125_s24 + $0x90] sm:$0xff]  ;;  %v405_v22 = vld [vmem:[%s2125_s24 + $0x98] sm:$0xff]  ;;  %v1028_v23 = vld [vmem:[%s2517_s5] sm:$0xff]  ;;  %s1366_s13 = scalar_lea.sflag [#allocation5], %s2121_s26  ;;  %p2540_p3 = scmp.ne.s32.totalorder %s2531_s18, 0 }
  0x64   : > { %1594 = vmatprep.mubr.msk.f32.mxu0 %vm415_vm0, %v388_v5  ;;  %v1029_v24 = vld [vmem:[%s2517_s5 + $0x8] sm:$0xff]  ;;  %v1030_v26 = vld [vmem:[%s2517_s5 + $0x10] sm:$0xff]  ;;  %v1031_v27 = vld [vmem:[%s2517_s5 + $0x18] sm:$0xff]  ;;  %s1913_s30 = smov [#allocation8]  }
  0x65   : > { %v1653_v25 = vpack.c.bf16 %v1029_v24, %v1028_v23  ;;  %v1657_v28 = vpack.c.bf16 %v1031_v27, %v1030_v26  ;;  %v1032_v29 = vld [vmem:[%s2517_s5 + $0x20] sm:$0xff]  ;;  %v1033_v30 = vld [vmem:[%s2517_s5 + $0x28] sm:$0xff]  ;;  %v1034_v32 = vld [vmem:[%s2517_s5 + $0x30] sm:$0xff] }
  0x66   : > { %v1661_v31 = vpack.c.bf16 %v1033_v30, %v1032_v29  ;;  %v1035_v33 = vld [vmem:[%s2517_s5 + $0x38] sm:$0xff]  ;;  %v2212_v35 = vld [vmem:[%s2514_s2] ss:$0 sm:$0xff]  ;;  %v2247_v3 = vld [vmem:[%s2515_s3 + $0x1] ss:$0 sm:$0xff] }
  0x67   : > { %1595 = vmatmul.mubr.msk.f32.gmra.mrb[2].mxu0 %vm415_vm0, %v389_v6  ;;  %1654 = vmatprep.subr.bf16.mxu1 %v1653_v25  ;;  %v1665_v34 = vpack.c.bf16 %v1035_v33, %v1034_v32  ;;  %v2242_v2 = vld [vmem:[%s2515_s3] ss:$0 sm:$0xff]  ;;  %v2255_v6 = vld [vmem:[%s2515_s3 + $0x2] ss:$0 sm:$0xff] }
  0x68   : > { %1597 = vmatprep.mubr.msk.f32.mxu0 %vm415_vm0, %v390_v7  ;;  %1656 = vmatpush3.bf16.msra.mxu1 %v1653_v25  ;;  %v2276_v25 = vld [vmem:[%s2515_s3 + $0x5] ss:$0 sm:$0xff] }
  0x69   : > { %1658 = vmatprep.subr.bf16.mxu1 %v1657_v28 }
  0x6b   : > { %1598 = vmatmul.mubr.msk.f32.gmra.mrb[4].mxu0 %vm415_vm0, %v391_v8 }
  0x6c   : > { %1600 = vmatprep.mubr.msk.f32.mxu0 %vm415_vm0, %v392_v9  ;;  %1660 = vmatpush3.bf16.msra.mxu1 %v1657_v28 }
  0x6d   : > { %1662 = vmatprep.subr.bf16.mxu1 %v1661_v31 }
  0x6f   : > { %1601 = vmatmul.mubr.msk.f32.gmra.mrb[6].mxu0 %vm415_vm0, %v393_v10 }
  0x70   : > { %1603 = vmatprep.mubr.msk.f32.mxu0 %vm415_vm0, %v394_v11  ;;  %1664 = vmatpush3.bf16.msra.mxu1 %v1661_v31  ;;  %v2285_v31 = vld [vmem:[%s2515_s3 + $0x6] ss:$0 sm:$0xff] }
  0x71   : > { %1666 = vmatprep.subr.bf16.mxu1 %v1665_v34 }
  0x73   : > { %1604 = vmatmul.mubr.msk.f32.gmra.mrb[8].mxu0 %vm415_vm0, %v395_v12 }
  0x74   : > { %1606 = vmatprep.mubr.msk.f32.mxu0 %vm415_vm0, %v396_v13  ;;  %1668 = vmatpush3.bf16.msra.mxu1 %v1665_v34 }
  0x77   : > { %1607 = vmatmul.mubr.msk.f32.gmra.mrb[10].mxu0 %vm415_vm0, %v397_v14 }
  0x78   : > { %1609 = vmatprep.mubr.msk.f32.mxu0 %vm415_vm0, %v398_v15 }
  0x7b   : > { %1610 = vmatmul.mubr.msk.f32.gmra.mrb[12].mxu0 %vm415_vm0, %v399_v16 }
  0x7c   : > { %1612 = vmatprep.mubr.msk.f32.mxu0 %vm415_vm0, %v400_v17  ;;  %v2266_v17 = vld [vmem:[%s2515_s3 + $0x4] ss:$0 sm:$0xff] }
  0x7f   : > { %1613 = vmatmul.mubr.msk.f32.gmra.mrb[14].mxu0 %vm415_vm0, %v401_v18 }
  0x80   : > { %1615 = vmatprep.mubr.msk.f32.mxu0 %vm415_vm0, %v402_v19 }
  0x83   : > { %1616 = vmatmul.mubr.msk.f32.gmra.mrb[16].mxu0 %vm415_vm0, %v403_v20 }
  0x84   : > { %1618 = vmatprep.mubr.msk.f32.mxu0 %vm415_vm0, %v404_v21 }
  0x87   : > { %1619 = vmatmul.mubr.msk.f32.gmra.mrb[18].mxu0 %vm415_vm0, %v405_v22 }
 0x136   : > { %v1593_v36 = vpop.f32.mrb[0].mxu0 }
 0x137   : > { %v548_v37 = vadd.f32 %v1593_v36, %v2212_v35  ;;  %v542_v38 = vpop.f32.mrb[1].mxu0 }
 0x138   : > { %v543_v39 = vadd.f32 %v2212_v35, %v542_v38 }
 0x139   : > { %v642_v40 = vmax.f32 %v548_v37, 0.0  ;;  %v2292_v37 = vld [vmem:[%s2515_s3 + $0x9] ss:$0 sm:$0xff] }
 0x13a   : > { %v641_v41 = vmax.f32 %v543_v39, 0.0  ;;  %v1596_v42 = vpop.f32.mrb[2].mxu0 }
 0x13b   : > { %v662_v43 = vmin.f32 %v642_v40, 6.0  ;;  %v558_v44 = vadd.f32 %v1596_v42, %v2212_v35  ;;  %v552_v45 = vpop.f32.mrb[3].mxu0  ;;  %v2300_v42 = vld [vmem:[%s2515_s3 + $0xa] ss:$0 sm:$0xff] }
 0x13c   : > { %v661_v46 = vmin.f32 %v641_v41, 6.0  ;;  %v553_v47 = vadd.f32 %v2212_v35, %v552_v45 }
 0x13d   : > { %683 = vst.msk [vmem:[#allocation2 + $0x8] sm:$0xff] %vm681_vm1, %v662_v43  ;;  %v644_v48 = vmax.f32 %v558_v44, 0.0 }
 0x13e   : > { %713 = vst.msk [vmem:[#allocation2 + $0x9] sm:$0x1] %vm702_vm2, %v1903_v49  ;;  %v643_v50 = vmax.f32 %v553_v47, 0.0  ;;  %v1599_v51 = vpop.f32.mrb[4].mxu0 }
 0x13f   : > { %682 = vst.msk [vmem:[#allocation2] sm:$0xff] %vm681_vm1, %v661_v46  ;;  %728 = vst.msk [vmem:[#allocation2 + $0x8] sm:$0xff] %vm681_vm1, %v1903_v49  ;;  %v664_v52 = vmin.f32 %v644_v48, 6.0  ;;  %v568_v53 = vadd.f32 %v1599_v51, %v2212_v35  ;;  %v562_v54 = vpop.f32.mrb[5].mxu0  ;;  %v2309_v48 = vld [vmem:[%s2515_s3 + $0x8] ss:$0 sm:$0xff] }
 0x140   : > { %703 = vst.msk [vmem:[#allocation2] sm:$0x1] %vm702_vm2, %v1903_v49  ;;  %v663_v55 = vmin.f32 %v643_v50, 6.0  ;;  %v563_v56 = vadd.f32 %v2212_v35, %v562_v54 }
 0x141   : > { %727 = vst.msk [vmem:[#allocation2] sm:$0xff] %vm681_vm1, %v1903_v49  ;;  %685 = vst.msk [vmem:[#allocation2 + $0x18] sm:$0xff] %vm681_vm1, %v664_v52  ;;  %v646_v57 = vmax.f32 %v568_v53, 0.0 }
 0x142   : > { %714 = vst.msk [vmem:[#allocation2 + $0x19] sm:$0x1] %vm702_vm2, %v1903_v49  ;;  %v645_v58 = vmax.f32 %v563_v56, 0.0  ;;  %v1602_v59 = vpop.f32.mrb[6].mxu0 }
 0x143   : > { %684 = vst.msk [vmem:[#allocation2 + $0x10] sm:$0xff] %vm681_vm1, %v663_v55  ;;  %v666_v60 = vmin.f32 %v646_v57, 6.0  ;;  %v578_v61 = vadd.f32 %v1602_v59, %v2212_v35  ;;  %v572_v62 = vpop.f32.mrb[7].mxu0 }
 0x144   : > { %704 = vst.msk [vmem:[#allocation2 + $0x10] sm:$0x1] %vm702_vm2, %v1903_v49  ;;  %v665_v63 = vmin.f32 %v645_v58, 6.0  ;;  %v573_v0 = vadd.f32 %v2212_v35, %v572_v62 }
 0x145   : > { %687 = vst.msk [vmem:[#allocation2 + $0x28] sm:$0xff] %vm681_vm1, %v666_v60  ;;  %v648_v1 = vmax.f32 %v578_v61, 0.0 }
 0x146   : > { %715 = vst.msk [vmem:[#allocation2 + $0x29] sm:$0x1] %vm702_vm2, %v1903_v49  ;;  %v647_v4 = vmax.f32 %v573_v0, 0.0  ;;  %v1605_v5 = vpop.f32.mrb[8].mxu0 }
 0x147   : > { %686 = vst.msk [vmem:[#allocation2 + $0x20] sm:$0xff] %vm681_vm1, %v665_v63  ;;  %v668_v7 = vmin.f32 %v648_v1, 6.0  ;;  %v588_v8 = vadd.f32 %v1605_v5, %v2212_v35  ;;  %v582_v9 = vpop.f32.mrb[9].mxu0 }
 0x148   : > { %705 = vst.msk [vmem:[#allocation2 + $0x20] sm:$0x1] %vm702_vm2, %v1903_v49  ;;  %v732_v10 = vld [vmem:[#allocation2] sm:$0xff]  ;;  %v667_v13 = vmin.f32 %v647_v4, 6.0  ;;  %v583_v14 = vadd.f32 %v2212_v35, %v582_v9 }
 0x149   : > { %v761_v11 = vld [vmem:[#allocation2 + $0x1] sm:$0xff]  ;;  %v745_v15 = vmul.f32 %v2242_v2, %v732_v10  ;;  %689 = vst.msk [vmem:[#allocation2 + $0x38] sm:$0xff] %vm681_vm1, %v668_v7  ;;  %v650_v18 = vmax.f32 %v588_v8, 0.0 }
 0x14a   : > { %v790_v12 = vld [vmem:[#allocation2 + $0x2] sm:$0xff]  ;;  %v774_v16 = vmul.f32 %v2247_v3, %v761_v11  ;;  %v850_v20 = vld [vmem:[#allocation2 + $0x11] sm:$0xff]  ;;  %716 = vst.msk [vmem:[#allocation2 + $0x39] sm:$0x1] %vm702_vm2, %v1903_v49  ;;  %v649_v21 = vmax.f32 %v583_v14, 0.0  ;;  %v1608_v22 = vpop.f32.mrb[10].mxu0 }
 0x14b   : > { %v803_v19 = vmul.f32 %v2255_v6, %v790_v12  ;;  %688 = vst.msk [vmem:[#allocation2 + $0x30] sm:$0xff] %vm681_vm1, %v667_v13  ;;  %v820_v24 = vld [vmem:[#allocation2 + $0x10] sm:$0xff]  ;;  %v670_v26 = vmin.f32 %v650_v18, 6.0  ;;  %v598_v27 = vadd.f32 %v1608_v22, %v2212_v35  ;;  %v592_v28 = vpop.f32.mrb[11].mxu0  ;;  %v775_v38 = vmul.f32 %v2247_v3, %v850_v20 }
 0x14c   : > { %v782_v23 = vadd.f32 %v774_v16, %v745_v15  ;;  %706 = vst.msk [vmem:[#allocation2 + $0x30] sm:$0x1] %vm702_vm2, %v1903_v49  ;;  %v834_v29 = vmul.f32 %v2266_v17, %v820_v24  ;;  %v879_v30 = vld [vmem:[#allocation2 + $0x12] sm:$0xff]  ;;  %v746_v32 = vmul.f32 %v2242_v2, %v820_v24  ;;  %v669_v33 = vmin.f32 %v649_v21, 6.0 }
 0x14d   : > { %v593_v34 = vadd.f32 %v2212_v35, %v592_v28  ;;  %691 = vst.msk [vmem:[#allocation2 + $0x48] sm:$0xff] %vm681_vm1, %v670_v26  ;;  %v652_v39 = vmax.f32 %v598_v27, 0.0  ;;  %v863_v40 = vmul.f32 %v2276_v25, %v850_v20  ;;  %v892_v46 = vmul.f32 %v2285_v31, %v879_v30 }
 0x14e   : > { %v811_v36 = vadd.f32 %v803_v19, %v782_v23  ;;  %v939_v41 = vld [vmem:[#allocation2 + $0x21] sm:$0xff]  ;;  %717 = vst.msk [vmem:[#allocation2 + $0x49] sm:$0x1] %vm702_vm2, %v1903_v49  ;;  %v1611_v44 = vpop.f32.mrb[12].mxu0  ;;  %v804_v51 = vmul.f32 %v2255_v6, %v879_v30  ;;  %v783_v56 = vadd.f32 %v775_v38, %v746_v32  ;;  %v2349_v38 = vld [vmem:[%s2516_s4] ss:$0 sm:$0xff] }
 0x14f   : > { %690 = vst.msk [vmem:[#allocation2 + $0x40] sm:$0xff] %vm681_vm1, %v669_v33  ;;  %v651_v43 = vmax.f32 %v593_v34, 0.0  ;;  %v909_v47 = vld [vmem:[#allocation2 + $0x20] sm:$0xff]  ;;  %v672_v52 = vmin.f32 %v652_v39, 6.0  ;;  %v608_v53 = vadd.f32 %v1611_v44, %v2212_v35  ;;  %v602_v54 = vpop.f32.mrb[13].mxu0  ;;  %v952_v55 = vmul.f32 %v2292_v37, %v939_v41 }
 0x150   : > { %v842_v45 = vadd.f32 %v834_v29, %v811_v36  ;;  %v968_v50 = vld [vmem:[#allocation2 + $0x22] sm:$0xff]  ;;  %707 = vst.msk [vmem:[#allocation2 + $0x40] sm:$0x1] %vm702_vm2, %v1903_v49  ;;  %v603_v58 = vadd.f32 %v2212_v35, %v602_v54  ;;  %v835_v60 = vmul.f32 %v2266_v17, %v909_v47  ;;  %v923_v62 = vmul.f32 %v2309_v48, %v909_v47 }
 0x151   : > { %v671_v57 = vmin.f32 %v651_v43, 6.0  ;;  %693 = vst.msk [vmem:[#allocation2 + $0x58] sm:$0xff] %vm681_vm1, %v672_v52  ;;  %v654_v61 = vmax.f32 %v608_v53, 0.0  ;;  %v981_v63 = vmul.f32 %v2300_v42, %v968_v50  ;;  %v812_v0 = vadd.f32 %v804_v51, %v783_v56 }
 0x152   : > { %v871_v59 = vadd.f32 %v863_v40, %v842_v45  ;;  %v2321_v1 = vld [vmem:[#allocation2 + $0x31] sm:$0xff]  ;;  %718 = vst.msk [vmem:[#allocation2 + $0x59] sm:$0x1] %vm702_vm2, %v1903_v49  ;;  %v653_v4 = vmax.f32 %v603_v58, 0.0  ;;  %v1614_v5 = vpop.f32.mrb[14].mxu0  ;;  %v864_v8 = vmul.f32 %v2276_v25, %v939_v41  ;;  %v893_v9 = vmul.f32 %v2285_v31, %v968_v50 }
 0x153   : > { %692 = vst.msk [vmem:[#allocation2 + $0x50] sm:$0xff] %vm681_vm1, %v671_v57  ;;  %v910_v10 = vld [vmem:[#allocation2 + $0x30] sm:$0xff]  ;;  %v674_v11 = vmin.f32 %v654_v61, 6.0  ;;  %v618_v12 = vadd.f32 %v1614_v5, %v2212_v35  ;;  %v612_v13 = vpop.f32.mrb[15].mxu0  ;;  %v843_v14 = vadd.f32 %v835_v60, %v812_v0  ;;  %v953_v15 = vmul.f32 %v2292_v37, %v2321_v1 }
 0x154   : > { %v900_v7 = vadd.f32 %v892_v46, %v871_v59  ;;  %708 = vst.msk [vmem:[#allocation2 + $0x50] sm:$0x1] %vm702_vm2, %v1903_v49  ;;  %v673_v16 = vmin.f32 %v653_v4, 6.0  ;;  %v613_v18 = vadd.f32 %v2212_v35, %v612_v13  ;;  %v747_v20 = vmul.f32 %v2242_v2, %v909_v47  ;;  %v969_v24 = vld [vmem:[#allocation2 + $0x32] sm:$0xff] }
 0x155   : > { %695 = vst.msk [vmem:[#allocation2 + $0x68] sm:$0xff] %vm681_vm1, %v674_v11  ;;  %v656_v21 = vmax.f32 %v618_v12, 0.0  ;;  %v872_v22 = vadd.f32 %v864_v8, %v843_v14  ;;  %v924_v23 = vmul.f32 %v2309_v48, %v910_v10  ;;  %v776_v26 = vmul.f32 %v2247_v3, %v939_v41 }
 0x156   : > { %v931_v19 = vadd.f32 %v923_v62, %v900_v7  ;;  %719 = vst.msk [vmem:[#allocation2 + $0x69] sm:$0x1] %vm702_vm2, %v1903_v49  ;;  %v655_v27 = vmax.f32 %v613_v18, 0.0  ;;  %v1617_v28 = vpop.f32.mrb[16].mxu0  ;;  %v805_v30 = vmul.f32 %v2255_v6, %v968_v50  ;;  %v836_v32 = vmul.f32 %v2266_v17, %v910_v10  ;;  %v941_v14 = vld [vmem:[#allocation2 + $0x41] sm:$0xff] }
 0x157   : > { %694 = vst.msk [vmem:[#allocation2 + $0x60] sm:$0xff] %vm681_vm1, %v673_v16  ;;  %v676_v33 = vmin.f32 %v656_v21, 6.0  ;;  %v628_v34 = vadd.f32 %v1617_v28, %v2212_v35  ;;  %v622_v36 = vpop.f32.mrb[17].mxu0  ;;  %v901_v39 = vadd.f32 %v893_v9, %v872_v22  ;;  %v784_v40 = vadd.f32 %v776_v26, %v747_v20  ;;  %v911_v41 = vld [vmem:[#allocation2 + $0x40] sm:$0xff] }
 0x158   : > { %v960_v29 = vadd.f32 %v952_v55, %v931_v19  ;;  %709 = vst.msk [vmem:[#allocation2 + $0x60] sm:$0x1] %vm702_vm2, %v1903_v49  ;;  %v675_v43 = vmin.f32 %v655_v27, 6.0  ;;  %v623_v44 = vadd.f32 %v2212_v35, %v622_v36  ;;  %v982_v46 = vmul.f32 %v2300_v42, %v969_v24 }
 0x159   : > { %697 = vst.msk [vmem:[#allocation2 + $0x78] sm:$0xff] %vm681_vm1, %v676_v33  ;;  %v658_v47 = vmax.f32 %v628_v34, 0.0  ;;  %v932_v50 = vadd.f32 %v924_v23, %v901_v39  ;;  %v813_v51 = vadd.f32 %v805_v30, %v784_v40  ;;  %v865_v52 = vmul.f32 %v2276_v25, %v2321_v1 }
 0x15a   : > { %v989_v45 = vadd.f32 %v981_v63, %v960_v29  ;;  %720 = vst.msk [vmem:[#allocation2 + $0x79] sm:$0x1] %vm702_vm2, %v1903_v49  ;;  %v657_v53 = vmax.f32 %v623_v44, 0.0  ;;  %v1620_v54 = vpop.f32.mrb[18].mxu0  ;;  %v894_v56 = vmul.f32 %v2285_v31, %v969_v24  ;;  %v925_v57 = vmul.f32 %v2309_v48, %v911_v41  ;;  %v942_v36 = vld [vmem:[#allocation2 + $0x51] sm:$0xff] }
 0x15b   : > { %696 = vst.msk [vmem:[#allocation2 + $0x70] sm:$0xff] %vm681_vm1, %v675_v43  ;;  %v678_v58 = vmin.f32 %v658_v47, 6.0  ;;  %v638_v59 = vadd.f32 %v1620_v54, %v2212_v35  ;;  %v632_v60 = vpop.f32.mrb[19].mxu0  ;;  %v961_v61 = vadd.f32 %v953_v15, %v932_v50  ;;  %v844_v62 = vadd.f32 %v836_v32, %v813_v51  ;;  %v912_v26 = vld [vmem:[#allocation2 + $0x50] sm:$0xff] }
 0x15c   : > { %v1004_v55 = vadd.f32 %v2349_v38, %v989_v45  ;;  %710 = vst.msk [vmem:[#allocation2 + $0x70] sm:$0x1] %vm702_vm2, %v1903_v49  ;;  %v677_v63 = vmin.f32 %v657_v53, 6.0  ;;  %v633_v0 = vadd.f32 %v2212_v35, %v632_v60  ;;  %v748_v5 = vmul.f32 %v2242_v2, %v910_v10  ;;  %v971_v39 = vld [vmem:[#allocation2 + $0x52] sm:$0xff] }
 0x15d   : > { %699 = vst.msk [vmem:[#allocation2 + $0x88] sm:$0xff] %vm681_vm1, %v678_v58  ;;  %v660_v7 = vmax.f32 %v638_v59, 0.0  ;;  %v990_v8 = vadd.f32 %v982_v46, %v961_v61  ;;  %v873_v9 = vadd.f32 %v865_v52, %v844_v62  ;;  %v777_v11 = vmul.f32 %v2247_v3, %v2321_v1  ;;  %v970_v1 = vld [vmem:[#allocation2 + $0x42] sm:$0xff] }
 0x15e   : > { %v1012_v4 = vmax.f32 %v1004_v55, 0.0  ;;  %721 = vst.msk [vmem:[#allocation2 + $0x89] sm:$0x1] %vm702_vm2, %v1903_v49  ;;  %v659_v12 = vmax.f32 %v633_v0, 0.0  ;;  %v806_v35 = vmul.f32 %v2255_v6, %v969_v24  ;;  %v837_v10 = vmul.f32 %v2266_v17, %v911_v41  ;;  %v943_v58 = vld [vmem:[#allocation2 + $0x61] sm:$0xff] }
 0x15f   : > { %698 = vst.msk [vmem:[#allocation2 + $0x80] sm:$0xff] %vm681_vm1, %v677_v63  ;;  %v680_v15 = vmin.f32 %v660_v7, 6.0  ;;  %v1005_v16 = vadd.f32 %v2349_v38, %v990_v8  ;;  %v902_v18 = vadd.f32 %v894_v56, %v873_v9  ;;  %v785_v19 = vadd.f32 %v777_v11, %v748_v5  ;;  %v913_v50 = vld [vmem:[#allocation2 + $0x60] sm:$0xff] }
 0x160   : > { %v1020_v13 = vmin.f32 %v1012_v4, 6.0  ;;  %711 = vst.msk [vmem:[#allocation2 + $0x80] sm:$0x1] %vm702_vm2, %v1903_v49  ;;  %v679_v20 = vmin.f32 %v659_v12, 6.0  ;;  %v954_v23 = vmul.f32 %v2292_v37, %v941_v14  ;;  %v983_v27 = vmul.f32 %v2300_v42, %v970_v1  ;;  %v972_v60 = vld [vmem:[#allocation2 + $0x62] sm:$0xff] }
 0x161   : > { %701 = vst.msk [vmem:[#allocation2 + $0x98] sm:$0xff] %vm681_vm1, %v680_v15  ;;  %v1013_v21 = vmax.f32 %v1005_v16, 0.0  ;;  %v933_v22 = vadd.f32 %v925_v57, %v902_v18  ;;  %v814_v24 = vadd.f32 %v806_v35, %v785_v19  ;;  %v749_v28 = vmul.f32 %v2242_v2, %v911_v41 }
 0x162   : > { %1637 = vmatprep.mubr.msk.f32.mxu1 %vm681_vm1, %v1020_v13  ;;  %722 = vst.msk [vmem:[#allocation2 + $0x99] sm:$0x1] %vm702_vm2, %v1903_v49  ;;  %v778_v29 = vmul.f32 %v2247_v3, %v941_v14  ;;  %v866_v34 = vmul.f32 %v2276_v25, %v941_v14  ;;  %v807_v41 = vmul.f32 %v2255_v6, %v970_v1 }
 0x163   : > { %700 = vst.msk [vmem:[#allocation2 + $0x90] sm:$0xff] %vm681_vm1, %v679_v20  ;;  %731 = vst.msk [vmem:[#allocation2 + $0x98] sm:$0xff] %vm681_vm1, %v1903_v49  ;;  %v1021_v30 = vmin.f32 %v1013_v21, 6.0  ;;  %v962_v32 = vadd.f32 %v954_v23, %v933_v22  ;;  %v845_v33 = vadd.f32 %v837_v10, %v814_v24  ;;  %v838_v43 = vmul.f32 %v2266_v17, %v912_v26  ;;  %v914_v8 = vld [vmem:[#allocation2 + $0x70] sm:$0xff] }
 0x164   : > { %712 = vst.msk [vmem:[#allocation2 + $0x90] sm:$0x1] %vm702_vm2, %v1903_v49  ;;  %v786_v40 = vadd.f32 %v778_v29, %v749_v28  ;;  %v895_v46 = vmul.f32 %v2285_v31, %v970_v1  ;;  %v926_v47 = vmul.f32 %v2309_v48, %v912_v26  ;;  %v955_v51 = vmul.f32 %v2292_v37, %v942_v36  ;;  %v944_v1 = vld [vmem:[#allocation2 + $0x71] sm:$0xff] }
 0x165   : > { %730 = vst.msk [vmem:[#allocation2 + $0x90] sm:$0xff] %vm681_vm1, %v1903_v49  ;;  %1638 = vmatmul.mubr.msk.f32.vlgmr.msra.gmra.mrb[0].mxu1 %vm681_vm1, %v1021_v30  ;;  %v991_v44 = vadd.f32 %v983_v27, %v962_v32  ;;  %v874_v45 = vadd.f32 %v866_v34, %v845_v33  ;;  %v750_v49 = vmul.f32 %v2242_v2, %v912_v26  ;;  %v973_v29 = vld [vmem:[#allocation2 + $0x72] sm:$0xff] }
 0x166   : > { %v815_v52 = vadd.f32 %v807_v41, %v786_v40  ;;  %v779_v53 = vmul.f32 %v2247_v3, %v942_v36  ;;  %v984_v56 = vmul.f32 %v2300_v42, %v971_v39  ;;  %v867_v57 = vmul.f32 %v2276_v25, %v942_v36 }
 0x167   : > { %v1006_v54 = vadd.f32 %v2349_v38, %v991_v44  ;;  %v903_v55 = vadd.f32 %v895_v46, %v874_v45  ;;  %v808_v62 = vmul.f32 %v2255_v6, %v971_v39  ;;  %v839_v63 = vmul.f32 %v2266_v17, %v913_v50  ;;  %v915_v32 = vld [vmem:[#allocation2 + $0x80] sm:$0xff] }
 0x168   : > { %v846_v59 = vadd.f32 %v838_v43, %v815_v52  ;;  %v787_v61 = vadd.f32 %v779_v53, %v750_v49  ;;  %v896_v5 = vmul.f32 %v2285_v31, %v971_v39  ;;  %v927_v7 = vmul.f32 %v2309_v48, %v913_v50 }
 0x169   : > { %v1014_v0 = vmax.f32 %v1006_v54, 0.0  ;;  %v934_v4 = vadd.f32 %v926_v47, %v903_v55  ;;  %v751_v12 = vmul.f32 %v2242_v2, %v913_v50  ;;  %v780_v13 = vmul.f32 %v2247_v3, %v943_v58  ;;  %v945_v54 = vld [vmem:[#allocation2 + $0x81] sm:$0xff] }
 0x16a   : > { %v875_v9 = vadd.f32 %v867_v57, %v846_v59  ;;  %v816_v11 = vadd.f32 %v808_v62, %v787_v61  ;;  %v868_v10 = vmul.f32 %v2276_v25, %v943_v58  ;;  %v809_v15 = vmul.f32 %v2255_v6, %v972_v60 }
 0x16b   : > { %v1022_v14 = vmin.f32 %v1014_v0, 6.0  ;;  %v963_v35 = vadd.f32 %v955_v51, %v934_v4  ;;  %v788_v19 = vadd.f32 %v780_v13, %v751_v12  ;;  %v840_v20 = vmul.f32 %v2266_v17, %v914_v8 }
 0x16c   : > { %v904_v16 = vadd.f32 %v896_v5, %v875_v9  ;;  %v847_v18 = vadd.f32 %v839_v63, %v816_v11  ;;  %v956_v22 = vmul.f32 %v2292_v37, %v943_v58  ;;  %v985_v23 = vmul.f32 %v2300_v42, %v972_v60  ;;  %v946_v5 = vld [vmem:[#allocation2 + $0x91] sm:$0xff] }
 0x16d   : > { %1640 = vmatprep.mubr.msk.f32.mxu1 %vm681_vm1, %v1022_v14  ;;  %v992_v21 = vadd.f32 %v984_v56, %v963_v35  ;;  %v897_v24 = vmul.f32 %v2285_v31, %v972_v60  ;;  %v928_v28 = vmul.f32 %v2309_v48, %v914_v8  ;;  %v817_v30 = vadd.f32 %v809_v15, %v788_v19  ;;  %v974_v60 = vld [vmem:[#allocation2 + $0x82] sm:$0xff]  ;;  %v975_v35 = vld [vmem:[#allocation2 + $0x92] sm:$0xff] }
 0x16e   : > { %v935_v26 = vadd.f32 %v927_v7, %v904_v16  ;;  %v876_v27 = vadd.f32 %v868_v10, %v847_v18  ;;  %v957_v34 = vmul.f32 %v2292_v37, %v944_v1  ;;  %v752_v36 = vmul.f32 %v2242_v2, %v914_v8 }
 0x16f   : > { %v1007_v33 = vadd.f32 %v2349_v38, %v992_v21  ;;  %v781_v39 = vmul.f32 %v2247_v3, %v944_v1  ;;  %v848_v43 = vadd.f32 %v840_v20, %v817_v30  ;;  %v869_v44 = vmul.f32 %v2276_v25, %v944_v1  ;;  %v1535_v30 = vld [vmem:[%s2518_s6] ss:$0 sm:$0xff] }
 0x170   : > { %v964_v40 = vadd.f32 %v956_v22, %v935_v26  ;;  %v905_v41 = vadd.f32 %v897_v24, %v876_v27  ;;  %v810_v47 = vmul.f32 %v2255_v6, %v973_v29  ;;  %v841_v50 = vmul.f32 %v2266_v17, %v915_v32  ;;  %v916_v6 = vld [vmem:[#allocation2 + $0x90] sm:$0xff] }
 0x171   : > { %v1015_v45 = vmax.f32 %v1007_v33, 0.0  ;;  %v789_v46 = vadd.f32 %v781_v39, %v752_v36  ;;  %v877_v49 = vadd.f32 %v869_v44, %v848_v43  ;;  %v898_v53 = vmul.f32 %v2285_v31, %v973_v29 }
 0x172   : > { %v993_v51 = vadd.f32 %v985_v23, %v964_v40  ;;  %v936_v52 = vadd.f32 %v928_v28, %v905_v41  ;;  %v986_v3 = vmul.f32 %v2300_v42, %v973_v29  ;;  %v929_v59 = vmul.f32 %v2309_v48, %v915_v32  ;;  %v1175_v40 = vld [vmem:[%s2133_s16 + $0x18] sm:$0xff]  ;;  %v1172_v41 = vld [vmem:[%s2133_s16] sm:$0xff] }
 0x173   : > { %v1023_v2 = vmin.f32 %v1015_v45, 6.0  ;;  %v818_v55 = vadd.f32 %v810_v47, %v789_v46  ;;  %v906_v58 = vadd.f32 %v898_v53, %v877_v49  ;;  %v870_v61 = vmul.f32 %v2276_v25, %v945_v54  ;;  %v1174_v45 = vld [vmem:[%s2133_s16 + $0x10] sm:$0xff] }
 0x174   : > { %v1008_v56 = vadd.f32 %v2349_v38, %v993_v51  ;;  %v965_v57 = vadd.f32 %v957_v34, %v936_v52  ;;  %v958_v4 = vmul.f32 %v2292_v37, %v945_v54  ;;  %v899_v8 = vmul.f32 %v2285_v31, %v974_v60  ;;  %v1173_v34 = vld [vmem:[%s2133_s16 + $0x8] sm:$0xff] }
 0x175   : > { %1641 = vmatmul.mubr.msk.f32.gmra.mrb[2].mxu1 %vm681_vm1, %v1023_v2  ;;  %v849_v17 = vadd.f32 %v841_v50, %v818_v55  ;;  %v937_v0 = vadd.f32 %v929_v59, %v906_v58  ;;  %v930_v9 = vmul.f32 %v2309_v48, %v916_v6  ;;  %v987_v14 = vmul.f32 %v2300_v42, %v974_v60 }
 0x176   : > { %v1016_v62 = vmax.f32 %v1008_v56, 0.0  ;;  %v994_v63 = vadd.f32 %v986_v3, %v965_v57  ;;  %v959_v25 = vmul.f32 %v2292_v37, %v946_v5  ;;  %v988_v1 = vmul.f32 %v2300_v42, %v975_v35  ;;  %v1177_v5 = vld [vmem:[%s2133_s16 + $0x28] sm:$0xff] }
 0x177   : > { %v878_v7 = vadd.f32 %v870_v61, %v849_v17  ;;  %v966_v13 = vadd.f32 %v958_v4, %v937_v0  ;;  %v1904_v27 = vmov 1983009808   ;;  %v1193_v29 = vlaneseq }
 0x178   : > { %v1024_v11 = vmin.f32 %v1016_v62, 6.0  ;;  %v1009_v12 = vadd.f32 %v2349_v38, %v994_v63  ;;  %v1191_v28 = vunpack.c.l.s4 %v1904_v27  ;;  %v1905_v0 = vmov 1934713408  }
 0x179   : > { %v907_v10 = vadd.f32 %v899_v8, %v878_v7  ;;  %v995_v16 = vadd.f32 %v987_v14, %v966_v13  ;;  %v1194_v33 = vshrl.u32 %v1193_v29, 7  ;;  %v1255_v4 = vunpack.c.l.s4 %v1905_v0  ;;  %v1178_v14 = vld [vmem:[%s2133_s16 + $0x30] sm:$0xff] }
 0x17a   : > { %1643 = vmatprep.mubr.msk.f32.mxu1 %vm681_vm1, %v1024_v11  ;;  %v1017_v15 = vmax.f32 %v1009_v12, 0.0  ;;  %v1176_v11 = vld [vmem:[%s2133_s16 + $0x20] sm:$0xff] }
 0x17b   : > { %v938_v18 = vadd.f32 %v930_v9, %v907_v10  ;;  %v1010_v48 = vadd.f32 %v2349_v38, %v995_v16  ;;  %v1179_v9 = vld [vmem:[%s2133_s16 + $0x38] sm:$0xff]  ;;  %s1906_s16 = smov 48  }
 0x17c   : > { %v1025_v31 = vmin.f32 %v1017_v15, 6.0  ;;  %v1256_v15 = vunpack.c.0.s8 %v1255_v4 }
 0x17d   : > { %v967_v19 = vadd.f32 %v959_v25, %v938_v18  ;;  %v1018_v20 = vmax.f32 %v1010_v48, 0.0 }
 0x17e   : > { %1644 = vmatmul.mubr.msk.f32.gmra.mrb[4].mxu1 %vm681_vm1, %v1025_v31 }
 0x17f   : > { %v996_v21 = vadd.f32 %v988_v1, %v967_v19  ;;  %v1026_v22 = vmin.f32 %v1018_v20, 6.0 }
 0x181   : > { %v1011_v23 = vadd.f32 %v2349_v38, %v996_v21  ;;  %1646 = vmatprep.mubr.msk.f32.mxu1 %vm681_vm1, %v1026_v22  ;;  %v1192_v38 = vunpack.c.0.s8 %v1191_v28  ;;  %v1259_v22 = vsub.s32 %v1256_v15, %v1194_v33 }
 0x183   : > { %v1019_v37 = vmax.f32 %v1011_v23, 0.0  ;;  %v1195_v51 = vsub.s32 %v1192_v38, %v1194_v33 }
 0x185   : > { %v1027_v24 = vmin.f32 %v1019_v37, 6.0 }
 0x187   : > { %1647 = vmatmul.mubr.msk.f32.gmra.mrb[6].mxu1 %vm681_vm1, %v1027_v24 }
 0x238   : > { %v1639_v42 = vpop.f32.mrb[0].mxu1 }
 0x239   : > { %v1133_v26 = vpop.f32.mrb[1].mxu1  ;;  %v1139_v32 = vadd.f32 %v1639_v42, %v1535_v30 }
 0x23a   : > { %v1134_v36 = vadd.f32 %v1535_v30, %v1133_v26 }
 0x23b   : > { %v1181_v47 = vadd.f32 %v1173_v34, %v1139_v32 }
 0x23c   : > { %v1180_v52 = vadd.f32 %v1172_v41, %v1134_v36 }
 0x248   : > { %v1642_v39 = vpop.f32.mrb[2].mxu1 }
 0x249   : > { %v1149_v43 = vadd.f32 %v1642_v39, %v1535_v30  ;;  %v1143_v44 = vpop.f32.mrb[3].mxu1 }
 0x24a   : > { %v1144_v46 = vadd.f32 %v1535_v30, %v1143_v44 }
 0x24b   : > { %v1183_v50 = vadd.f32 %v1175_v40, %v1149_v43 }
 0x24c   : > { %v1182_v49 = vadd.f32 %v1174_v45, %v1144_v46 }
 0x24d   : > { %v1204_v53 = vcombine.low %v1181_v47, %v1183_v50  ;;  %v1205_v54 = vcombine.high %v1181_v47, %v1183_v50 }
 0x24e   : > { %v1188_v2 = vcombine.low %v1180_v52, %v1182_v49  ;;  %v1189_v3 = vcombine.high %v1180_v52, %v1182_v49 }
 0x24f   : > { %v1212_v55 = vrot.slane %v1204_v53, %v1195_v51  ;;  %v1219_v56 = vrot.slane %v1205_v54, %v1195_v51 }
 0x250   : > { %v1196_v57 = vrot.slane %v1188_v2, %v1195_v51  ;;  %v1203_v58 = vrot.slane %v1189_v3, %v1195_v51 }
 0x251   : > { %v1645_v59 = vpop.f32.mrb[4].mxu1 }
 0x252   : > { %v1153_v60 = vpop.f32.mrb[5].mxu1  ;;  %v1253_v6 = vcombine.high %v1196_v57, %v1212_v55  ;;  %v1252_v17 = vcombine.low %v1196_v57, %v1212_v55  ;;  %v1268_v61 = vcombine.low %v1203_v58, %v1219_v56  ;;  %v1269_v62 = vcombine.high %v1203_v58, %v1219_v56 }
 0x253   : > { %v1159_v63 = vadd.f32 %v1645_v59, %v1535_v30  ;;  %v1154_v7 = vadd.f32 %v1535_v30, %v1153_v60 }
 0x254   : > { %v1267_v28 = vrot.slane %v1253_v6, %v1259_v22  ;;  %v1260_v29 = vrot.slane %v1252_v17, %v1259_v22  ;;  %v1283_v39 = vrot.slane %v1269_v62, %v1259_v22 }
 0x255   : > { %v1185_v10 = vadd.f32 %v1177_v5, %v1159_v63  ;;  %v1184_v16 = vadd.f32 %v1176_v11, %v1154_v7 }
 0x25a   : > { %v1648_v8 = vpop.f32.mrb[6].mxu1 }
 0x25b   : > { %v1169_v12 = vadd.f32 %v1648_v8, %v1535_v30  ;;  %v1163_v13 = vpop.f32.mrb[7].mxu1 }
 0x25c   : > { %v1164_v35 = vadd.f32 %v1535_v30, %v1163_v13  ;;  %v1276_v30 = vrot.slane %v1268_v61, %v1259_v22 }
 0x25d   : > { %v1187_v25 = vadd.f32 %v1179_v9, %v1169_v12 }
 0x25e   : > { %v1186_v18 = vadd.f32 %v1178_v14, %v1164_v35 }
 0x25f   : > { %v1236_v1 = vcombine.low %v1185_v10, %v1187_v25  ;;  %v1237_v31 = vcombine.high %v1185_v10, %v1187_v25 }
 0x260   : > { %v1220_v48 = vcombine.low %v1184_v16, %v1186_v18  ;;  %v1221_v19 = vcombine.high %v1184_v16, %v1186_v18 }
 0x261   : > { %v1244_v20 = vrot.slane %v1236_v1, %v1195_v51  ;;  %v1251_v21 = vrot.slane %v1237_v31, %v1195_v51 }
 0x262   : > { %v1228_v23 = vrot.slane %v1220_v48, %v1195_v51  ;;  %v1235_v37 = vrot.slane %v1221_v19, %v1195_v51 }
 0x264   : > { %v1285_v24 = vcombine.high %v1228_v23, %v1244_v20  ;;  %v1284_v42 = vcombine.low %v1228_v23, %v1244_v20  ;;  %v1300_v26 = vcombine.low %v1235_v37, %v1251_v21  ;;  %v1301_v27 = vcombine.high %v1235_v37, %v1251_v21 }
 0x266   : > { %v1299_v32 = vrot.slane %v1285_v24, %v1259_v22  ;;  %v1292_v38 = vrot.slane %v1284_v42, %v1259_v22  ;;  %v1308_v34 = vrot.slane %v1300_v26, %v1259_v22  ;;  %v1315_v36 = vrot.slane %v1301_v27, %v1259_v22 }
 0x268   : > { %v1319_v40 = vcombine.high %v1267_v28, %v1299_v32  ;;  %v1317_v41 = vcombine.high %v1260_v29, %v1292_v38  ;;  %v1316_v43 = vcombine.low %v1260_v29, %v1292_v38  ;;  %v1320_v44 = vcombine.low %v1276_v30, %v1308_v34 }
 0x269   : > { %v1318_v45 = vcombine.low %v1267_v28, %v1299_v32  ;;  %v1322_v33 = vcombine.low %v1283_v39, %v1315_v36  ;;  %v1321_v46 = vcombine.high %v1276_v30, %v1308_v34  ;;  %v1323_v47 = vcombine.high %v1283_v39, %v1315_v36 }
 0x26a   : > { %1333 = vrot.lane.b32.xlu1 %v1319_v40, %s1906_s16  ;;  %1325 = vrot.lane.b32.xlu0 %v1317_v41, %s1907_s11  ;;  %s1811_s16 = scalar_lea.vmem %s2465_s29, 128  ;;  %s1815_s11 = sshll.u32 %s1913_s30, 4  ;;  %s1816_s11 = int_to_ptr.vmem [resolvable:$false] %s1815_s11 }
 0x26b   : > { %p1812_p0 = scmp.ne.s32.totalorder %s2465_s29, %s1811_s16  ;;  %p1818_p7 = scmp.lt.s32.totalorder %s2465_s29, %s1816_s11 }
 0x26d   : > { %p1813_p12 = pnand %p1812_p0, %p2540_p3 }
 0x26e   : > { %1337 = vrot.lane.b32.xlu1 %v1320_v44, %s1908_s0  ;;  %1329 = vrot.lane.b32.xlu0 %v1318_v45, %s1909_s17  ;;  %s1817_s0 = scalar_lea.vmem %s1816_s11, 256 }
 0x26f   : > { %p1814_p13 = pneg %p1813_p12  ;;  %p1819_p10 = scmp.lt.s32.totalorder %s1817_s0, %s1811_s16 }
 0x271   : > { %p1820_p9 = por %p1819_p10, %p1818_p7 }
 0x272   : > { %1345 = vrot.lane.b32.xlu1 %v1322_v33, %s1910_s19  ;;  %1341 = vrot.lane.b32.xlu0 %v1321_v46, %s1911_s25 }
 0x273   : > { %p1821_p11 = pnand %p1820_p9, %p1814_p13 }
 0x276   : > { %1349 = vrot.lane.b32.xlu0 %v1323_v47, %s1912_s15 }
 0x2dc   : > { %v1334_v50 = vpop.permute.xlu1 %1333  ;;  %v1326_v51 = vpop.permute.xlu0 %1325 }
 0x2dd   : > { %v1352_v52 = vsel %vm415_vm0, %v1316_v43, %v1326_v51 }
 0x2e0   : > { %v1338_v49 = vpop.permute.xlu1 %1337  ;;  %v1330_v53 = vpop.permute.xlu0 %1329 }
 0x2e1   : > { %v1354_v54 = vsel %vm1353_vm3, %v1352_v52, %v1330_v53 }
 0x2e2   : > { %v1356_v2 = vsel %vm1355_vm4, %v1354_v54, %v1334_v50 }
 0x2e3   : > { %v1357_v3 = vsel %vm681_vm1, %v1356_v2, %v1338_v49 }
 0x2e4   : > { %v1342_v55 = vpop.permute.xlu0 %1341  ;;  %v1346_v56 = vpop.permute.xlu1 %1345 }
 0x2e5   : > { %v1359_v57 = vsel %vm1358_vm5, %v1357_v3, %v1342_v55 }
 0x2e6   : > { %v1361_v59 = vsel %vm1360_vm6, %v1359_v57, %v1346_v56 }
 0x2e8   : > { %v1350_v58 = vpop.permute.xlu0 %1349 }
 0x2e9   : > { %v1363_v60 = vsel %vm1362_vm7, %v1361_v59, %v1350_v58 }
 0x2ea   : > { %1364 = vst [vmem:[%s381_s23] sm:$0xff] %v1363_v60 }
 0x2eb   : > { %1824 = shalt.err (!%p1821_p11)
}
 0x2ec   : > { %s1825_s26 = scalar_lea.hbm %s2463_s22, 128  ;;  %s1829_s25 = scalar_lea.hbm %s2520_s8, 256 }
 0x2ed   : > { %p1826_p1 = scmp.ne.s32.totalorder %s2463_s22, %s1825_s26  ;;  %p1830_p4 = scmp.lt.u32.totalorder %s2463_s22, %s2520_s8 }
 0x2ee   : > { %p1831_p6 = scmp.lt.u32.totalorder %s1829_s25, %s1825_s26  ;;  %p1833_p0 = scmp.lt.u32.totalorder %s1825_s26, %s2463_s22 }
 0x2ef   : > { %p1827_p5 = pnand %p1826_p1, %p2540_p3 }
 0x2f0   : > { %p1832_p8 = por %p1831_p6, %p1830_p4 }
 0x2f1   : > { %p1828_p2 = pneg %p1827_p5 }
 0x2f2   : > { %p1834_p12 = por %p1833_p0, %p1832_p8 }
 0x2f4   : > { %p1835_p13 = pnand %p1834_p12, %p1828_p2 }
 0x2f6   : > { %1838 = shalt.err (!%p1835_p13)
}
 0x2f7   : > { %1676 = dma.vmem_to_hbm [thread:$0]  (%p2540_p3), %s2465_s29, 128, %s2463_s22, %s1366_s13  }
 0x2f8 PF: > { %s1392_s12 = sand.u32 1, %s1877_s27   ;;  %p2541_p7 = scmp.ne.s32.totalorder %s2533_s20, 0 }
 0x2f9   : > { %p2542_p10 = scmp.ge.s32.totalorder %s1897_s10, 2  ;;  %s1393_s23 = scalar_lea.sflag [#allocation5], %s1392_s12 }
 0x2fb   : > { %p1686_p9 = pnand %p2542_p10, %p2541_p7 }
 0x2fd   : > { %1872 = dma.done.wait (!%p1686_p9), %s1393_s23, 128  }
 0x2fe   : > { %1874 = vsyncadd (!%p1686_p9), %s1393_s23, 4294967168  ;;  %s27_s10 = sadd.s32 1, %s1897_s10   ;;  %s2543_s24 = sld [smem:[#allocation12_spill]] }
 0x2ff   : > { %p24_p11 = scmp.ge.s32.totalorder %s27_s10, 4   ;;  %s2544_s29 = sld [smem:[#allocation14_spill]] }
 0x300   : > { %s2545_s18 = sld [smem:[#allocation13_spill]]  ;;  %s2546_s27 = smov %s1881_s28 }
 0x301   : > { %s2548_s30 = smov %s1893_s9  ;;  %26 = sbr.rel (!%p24_p11) target bundleno = 10 (0xa), region = 120 }
 0x304   : > { %s2547_s28 = smov %s2543_s24 }
 0x306   : > { %s2549_s9 = smov %s2545_s18 }
 0x308   :  { %1398 = vsyncpa [#allocation4], 1 }
 0x309   :  { %1400 = vsyncpa [#allocation4 + $0x1], 1 }
 0x30a   :  { %1401 = vsyncpa [#allocation7], 1 }
 0x30b   :  { %1403 = vsyncpa [#allocation7 + $0x1], 1 }
 0x30c   :  { %1404 = vsyncpa [#allocation5], 1 }
 0x30d   :  { %1406 = vsyncpa [#allocation5 + $0x1], 1 }

</bundles_post_ra>
